<compile_context>
chip_gen: v7x
topology: tpu7x:2x2x1
jax: 0.10.0
libtpu: 0.0.40
codegen_flags: <defaults>
</compile_context>

<pallas_src>
import functools
import math

import jax
import jax.numpy as jnp
from jax.experimental import pallas as pl
from jax.experimental.pallas import tpu as pltpu


def _myembed_kernel(x_ref, coef_ref, o_ref, *, tf, C):
    """x_ref: (C, thw) f32; coef_ref: (tf*C, 1) f32 (row = freq*pi);
    o_ref: (2*tf*C, thw) f32."""
    x = x_ref[...]                           # (C, thw)
    coef = coef_ref[...]                     # (tf*C, 1)
    phase = jnp.tile(x, (tf, 1)) * coef      # (tf*C, thw), lane-broadcast mul
    s = jnp.sin(phase)                       # one full-sublane EUP/VPU pass
    c = jnp.cos(phase)
    # Interleave [sin_f(C), cos_f(C)] per frequency; single unmasked,
    # lane-dense full-block store.
    parts = []
    for i in range(tf):
        parts.append(s[i * C:(i + 1) * C, :])
        parts.append(c[i * C:(i + 1) * C, :])
    o_ref[...] = jnp.concatenate(parts, axis=0)


def _pick_tiles(n_freqs, C, P, *, lane_cap=2048, vmem_budget=20 * 1024 * 1024):
    # Lane (spatial) tile: full extent when it fits, else a large multiple of
    # 128 (partial last block handled via a cdiv grid — no pad/slice pass).
    thw = P if P <= lane_cap else (lane_cap // 128) * 128

    def est_bytes(tf, thw_):
        out_blk = 2 * tf * C * thw_ * 4
        in_blk = C * thw_ * 4
        temps = 6 * tf * C * thw_ * 4        # phase / sin / cos / interleave
        return 2 * out_blk + 2 * in_blk + temps

    # Freq tile: divisor of N keeping both the coef block (tf*C rows) and the
    # output block (2*tf*C rows) 8-sublane aligned (or full-extent), within
    # the VMEM budget; capped at 64 to bound the interleave's trace size.
    divs = [d for d in range(1, n_freqs + 1) if n_freqs % d == 0]
    legal = [d for d in divs if (d * C) % 8 == 0 or d == n_freqs]
    fitting = [d for d in legal if d <= 64 and est_bytes(d, thw) <= vmem_budget]
    tf = max(fitting) if fitting else min(legal)

    # Last resort: shrink the lane tile (staying a multiple of 128).
    while est_bytes(tf, thw) > vmem_budget and thw > 128:
        new = ((thw // 2 + 127) // 128) * 128
        if new >= thw:
            break
        thw = new
    return tf, thw


def myembed_forward(x, freq_bands, *, lane_cap=2048):
    """x: (B, C, *spatial) -> (B, 2*N*C, *spatial) float32."""
    n_freqs = int(freq_bands.shape[0])
    B, C = int(x.shape[0]), int(x.shape[1])
    spatial = tuple(int(s) for s in x.shape[2:])
    P = 1
    for s in spatial:
        P *= s

    x3 = x.reshape(B, C, P).astype(jnp.float32)

    tf, thw = _pick_tiles(n_freqs, C, P, lane_cap=lane_cap)
    c_out = 2 * n_freqs * C
    grid = (B, pl.cdiv(P, thw), n_freqs // tf)

    # Per-output-row phase coefficient: freq_{k} * pi, repeated C times per
    # freq (freqs are exact powers of two, so x*(freq*pi) == (x*freq)*pi in
    # f32, matching the torch module bit-for-bit away from overflow).
    coef = jnp.repeat(freq_bands.astype(jnp.float32) * math.pi, C).reshape(
        n_freqs * C, 1)

    kernel = functools.partial(_myembed_kernel, tf=tf, C=C)

    out = pl.pallas_call(
        kernel,
        out_shape=jax.ShapeDtypeStruct((B, c_out, P), jnp.float32),
        grid=grid,
        in_specs=[
            # x block index is constant along the innermost freq-chunk axis,
            # so it is DMA'd once per (batch, spatial tile), not per chunk.
            pl.BlockSpec((None, C, thw), lambda b, j, kf: (b, 0, j)),
            pl.BlockSpec((tf * C, 1), lambda b, j, kf: (kf, 0)),
        ],
        out_specs=pl.BlockSpec(
            (None, 2 * tf * C, thw), lambda b, j, kf: (b, kf, j)
        ),
        compiler_params=pltpu.CompilerParams(
            dimension_semantics=("parallel", "parallel", "arbitrary"),
            vmem_limit_bytes=32 * 1024 * 1024,
        ),
        cost_estimate=pl.CostEstimate(
            flops=B * C * P * n_freqs,
            transcendentals=2 * B * C * P * n_freqs,
            bytes_accessed=4 * (B * C * P + n_freqs * C + B * c_out * P),
        ),
    )(x3, coef)

    return out.reshape((B, c_out) + spatial)


class MyembedPallas:
    """JAX/Pallas equivalent of the PyTorch Myembed module."""

    def __init__(self, N=512):
        self.N_freqs = int(N)
        # 2 ** linspace(0, N-1, N): exact powers of two in float32 (like torch).
        self.freq_bands = 2.0 ** jnp.linspace(0.0, self.N_freqs - 1, self.N_freqs)

    def __call__(self, x):
        return myembed_forward(x, self.freq_bands)


if __name__ == "__main__":
    key = jax.random.PRNGKey(0)

    # Small shapes consistent with the module: NCHW input, small freq count.
    N_freqs = 8
    B, C, H, W = 2, 4, 16, 16
    x = jax.random.normal(key, (B, C, H, W), jnp.float32)

    mod = MyembedPallas(N=N_freqs)
    y = jax.block_until_ready(mod(x))

    # Reference (plain JAX, same math / same channel ordering as the torch module).
    blocks = []
    for k in range(N_freqs):
        f = mod.freq_bands[k]
        blocks.append(
            jnp.concatenate([jnp.sin(x * f * math.pi), jnp.cos(x * f * math.pi)], axis=1)
        )
    y_ref = jnp.concatenate(blocks, axis=1)

    assert y.shape == (B, 2 * N_freqs * C, H, W), y.shape
    max_err = float(jnp.max(jnp.abs(y - y_ref)))
    assert jnp.allclose(y, y_ref, atol=2e-3, rtol=0.0), max_err

    print("KERNEL_OK")
</pallas_src>

<mosaic_0001>
module attributes {stable_mosaic.version = 11 : i64} {
  func.func @_myembed_kernel(%arg0: i32, %arg1: i32, %arg2: i32, %arg3: memref<1x4x256xf32, #tpu.memory_space<vmem>>, %arg4: memref<32x1xf32, #tpu.memory_space<vmem>>, %arg5: memref<1x64x256xf32, #tpu.memory_space<vmem>>) attributes {dimension_semantics = [#tpu.dimension_semantics<parallel>, #tpu.dimension_semantics<parallel>, #tpu.dimension_semantics<arbitrary>], iteration_bounds = array<i64: 2, 1, 1>, scalar_prefetch = 0 : i64, scratch_operands = 0 : i64, tpu.core_type = #tpu.core_type<tc>, window_params = [{transform_indices = @transform_0, window_bounds = array<i64: 1, 4, 256>}, {transform_indices = @transform_1, window_bounds = array<i64: 32, 1>}, {transform_indices = @transform_2, window_bounds = array<i64: 1, 64, 256>}]} {
    %c0 = arith.constant 0 : index
    %c0_0 = arith.constant 0 : index
    %c0_1 = arith.constant 0 : index
    %0 = vector.load %arg3[%c0, %c0_0, %c0_1] : memref<1x4x256xf32, #tpu.memory_space<vmem>>, vector<1x4x256xf32>
    %1 = vector.shape_cast %0 : vector<1x4x256xf32> to vector<4x256xf32>
    %c0_2 = arith.constant 0 : index
    %c0_3 = arith.constant 0 : index
    %2 = vector.load %arg4[%c0_2, %c0_3] : memref<32x1xf32, #tpu.memory_space<vmem>>, vector<32x1xf32>
    %3 = tpu.concatenate %1, %1, %1, %1, %1, %1, %1, %1 in 0 : vector<4x256xf32>, vector<4x256xf32>, vector<4x256xf32>, vector<4x256xf32>, vector<4x256xf32>, vector<4x256xf32>, vector<4x256xf32>, vector<4x256xf32> -> vector<32x256xf32>
    %4 = vector.broadcast %2 : vector<32x1xf32> to vector<32x256xf32>
    %5 = arith.mulf %3, %4 : vector<32x256xf32>
    %6 = math.sin %5 : vector<32x256xf32>
    %7 = math.cos %5 : vector<32x256xf32>
    %8 = vector.extract_strided_slice %6 {offsets = [0, 0], sizes = [4, 256], strides = [1, 1]} : vector<32x256xf32> to vector<4x256xf32>
    %9 = vector.extract_strided_slice %7 {offsets = [0, 0], sizes = [4, 256], strides = [1, 1]} : vector<32x256xf32> to vector<4x256xf32>
    %10 = vector.extract_strided_slice %6 {offsets = [4, 0], sizes = [4, 256], strides = [1, 1]} : vector<32x256xf32> to vector<4x256xf32>
    %11 = vector.extract_strided_slice %7 {offsets = [4, 0], sizes = [4, 256], strides = [1, 1]} : vector<32x256xf32> to vector<4x256xf32>
    %12 = vector.extract_strided_slice %6 {offsets = [8, 0], sizes = [4, 256], strides = [1, 1]} : vector<32x256xf32> to vector<4x256xf32>
    %13 = vector.extract_strided_slice %7 {offsets = [8, 0], sizes = [4, 256], strides = [1, 1]} : vector<32x256xf32> to vector<4x256xf32>
    %14 = vector.extract_strided_slice %6 {offsets = [12, 0], sizes = [4, 256], strides = [1, 1]} : vector<32x256xf32> to vector<4x256xf32>
    %15 = vector.extract_strided_slice %7 {offsets = [12, 0], sizes = [4, 256], strides = [1, 1]} : vector<32x256xf32> to vector<4x256xf32>
    %16 = vector.extract_strided_slice %6 {offsets = [16, 0], sizes = [4, 256], strides = [1, 1]} : vector<32x256xf32> to vector<4x256xf32>
    %17 = vector.extract_strided_slice %7 {offsets = [16, 0], sizes = [4, 256], strides = [1, 1]} : vector<32x256xf32> to vector<4x256xf32>
    %18 = vector.extract_strided_slice %6 {offsets = [20, 0], sizes = [4, 256], strides = [1, 1]} : vector<32x256xf32> to vector<4x256xf32>
    %19 = vector.extract_strided_slice %7 {offsets = [20, 0], sizes = [4, 256], strides = [1, 1]} : vector<32x256xf32> to vector<4x256xf32>
    %20 = vector.extract_strided_slice %6 {offsets = [24, 0], sizes = [4, 256], strides = [1, 1]} : vector<32x256xf32> to vector<4x256xf32>
    %21 = vector.extract_strided_slice %7 {offsets = [24, 0], sizes = [4, 256], strides = [1, 1]} : vector<32x256xf32> to vector<4x256xf32>
    %22 = vector.extract_strided_slice %6 {offsets = [28, 0], sizes = [4, 256], strides = [1, 1]} : vector<32x256xf32> to vector<4x256xf32>
    %23 = vector.extract_strided_slice %7 {offsets = [28, 0], sizes = [4, 256], strides = [1, 1]} : vector<32x256xf32> to vector<4x256xf32>
    %24 = tpu.concatenate %8, %9, %10, %11, %12, %13, %14, %15, %16, %17, %18, %19, %20, %21, %22, %23 in 0 : vector<4x256xf32>, vector<4x256xf32>, vector<4x256xf32>, vector<4x256xf32>, vector<4x256xf32>, vector<4x256xf32>, vector<4x256xf32>, vector<4x256xf32>, vector<4x256xf32>, vector<4x256xf32>, vector<4x256xf32>, vector<4x256xf32>, vector<4x256xf32>, vector<4x256xf32>, vector<4x256xf32>, vector<4x256xf32> -> vector<64x256xf32>
    %c0_4 = arith.constant 0 : index
    %c0_5 = arith.constant 0 : index
    %c0_6 = arith.constant 0 : index
    %25 = vector.load %arg5[%c0_4, %c0_5, %c0_6] : memref<1x64x256xf32, #tpu.memory_space<vmem>>, vector<1x64x256xf32>
    %26 = vector.shape_cast %25 : vector<1x64x256xf32> to vector<64x256xf32>
    %27 = vector.shape_cast %24 : vector<64x256xf32> to vector<1x64x256xf32>
    tpu.vector_store %arg5[%c0_4, %c0_5, %c0_6], %27 {strides = array<i32>} : memref<1x64x256xf32, #tpu.memory_space<vmem>>, vector<1x64x256xf32>,
    return
  }
  func.func @transform_0(%arg0: i32, %arg1: i32, %arg2: i32) -> (i32, i32, i32) {
    %c0_i32 = arith.constant 0 : i32
    %c0_i32_0 = arith.constant 0 : i32
    return %arg0, %c0_i32, %arg1 : i32, i32, i32
  }
  func.func @transform_1(%arg0: i32, %arg1: i32, %arg2: i32) -> (i32, i32) {
    %c0_i32 = arith.constant 0 : i32
    %c0_i32_0 = arith.constant 0 : i32
    return %arg2, %c0_i32 : i32, i32
  }
  func.func @transform_2(%arg0: i32, %arg1: i32, %arg2: i32) -> (i32, i32, i32) {
    %c0_i32 = arith.constant 0 : i32
    return %arg0, %arg2, %arg1 : i32, i32, i32
  }
}

</mosaic_0001>

<bundles_post_ra>
// kernel: tpu_custom_call.1
= control target key start
LH: loop header
LB: loop body
LE: loop exit
PB: predicated region body
PF: predicated region fallthrough
CT: control target
= control target key end

     0   :  { %7 = vsyncpa [#allocation3], 0  ;;  %s3456_s0 = inlined_call_operand.vmem [shape: f32[2,4,256], index: 0, kind: input, shape index: {}]   ;;  %s3457_s1 = inlined_call_operand.vmem [shape: f32[32,1], index: 1, kind: input, shape index: {}]   ;;  %s3458_s2 = inlined_call_operand.hbm [shape: f32[2,64,256], index: 2, kind: output, shape index: {}]  }
   0x1   :  { %9 = vsyncpa [#allocation3 + $0x1], 0  ;;  %s2417_s9 = smov 0   ;;  %s2419_s10 = smov 0  }
   0x2   :  { %s2421_s11 = smov 0   ;;  %s2423_s12 = smov 0  }
   0x3   :  { %s2425_s13 = smov 0   ;;  %s2427_s14 = smov 0  }
   0x4 LB: > { %s2100_s15 = sadd.s32 4294967295, %s2390_s14   ;;  %s2101_s16 = sadd.s32 4294967294, %s2390_s14   ;;  %s2390_s14 = sphi %s2427_s14, %s15_s14   ;;  %s2386_s13 = sphi %s2425_s13, %s3503_s13   ;;  %s2382_s12 = sphi %s2423_s12, %s3502_s12   ;;  %s2378_s11 = sphi %s2421_s11, %s3501_s11   ;;  %s2374_s10 = sphi %s2419_s10, %s3500_s10   ;;  %s2370_s9 = sphi %s2417_s9, %s3499_s9  }
   0x5   : > { %s34_s17 = sadd.s32 1, %s2386_s13  ;;  %s99_s18 = sadd.s32 1, %s2378_s11 }
   0x6   : > { %p36_p0 = scmp.ge.s32.totalorder %s34_s17, 2  ;;  %p109_p1 = scmp.ne.s32.totalorder %s2378_s11, %s2374_s10 }
   0x7   : > { %p110_p2 = scmp.eq.s32.totalorder %s2100_s15, 1  ;;  %p115_p3 = scmp.ne.s32.totalorder %s2374_s10, %s2370_s9 }
   0x8   : > { %s3505_s17 = smov (%p36_p0, %s34_s17), 0  ;;  %p116_p5 = scmp.eq.s32.totalorder %s2101_s16, 1 }
   0x9   : > { %p2457_p4 = por %p110_p2, %p109_p1  ;;  %s92_s20 = ssub.s32 %s2386_s13, %s3505_s17 }
   0xa   : > { %p2105_p6 = scmp.ge.s32.totalorder %s2390_s14, 1  ;;  %p97_p7 = scmp.eq.s32.totalorder %s92_s20, 0 }
   0xb   : > { %p2464_p8 = por %p116_p5, %p115_p3  ;;  %p156_p9 = scmp.lt.s32.totalorder %s2390_s14, 3 }
   0xc   : > { %s2470_s22 = scalar_select %p97_p7, %s2378_s11, %s99_s18  }
   0xd   : > { %p157_p10 = pnand %p2105_p6, %p156_p9 }
   0xe   : > { %v208_v0 = vld [vmem:[%s3457_s1 + $0x10] sm:$0xff] (!%p157_p10)  ;;  %v206_v1 = vld [vmem:[%s3457_s1] sm:$0xff] (!%p157_p10)  ;;  %v2392_v2 = vmov (!%p157_p10), 0   ;;  %v209_v3 = vld [vmem:[%s3457_s1 + $0x18] sm:$0xff] (!%p157_p10)  ;;  %p188_p11 = scmp.lt.s32.totalorder (!%p157_p10), %s2382_s12, 1  ;;  %vm215_vm0 = vcmask (!%p157_p10), 1043456  }
   0xf   : > { %160 = sbr.rel (%p157_p10) target bundleno = 410 (0x19a), region = 28  ;;  %2277 = vset.pattern.permute.xlu1 (!%p157_p10), %v2392_v2  ;;  %2276 = vset.pattern.permute.xlu0 (!%p157_p10), %v2392_v2  ;;  %v207_v4 = vld [vmem:[%s3457_s1 + $0x8] sm:$0xff] (!%p157_p10)  ;;  %v2393_v40 = vmov (!%p157_p10), 683565275   ;;  %v2394_v44 = vmov (!%p157_p10), 2475754826  }
  0x10   : > { %230 = vperm.xlu1 (!%p157_p10), %2277, %v208_v0   ;;  %220 = vperm.xlu0 (!%p157_p10), %2276, %v206_v1   ;;  %v2395_v46 = vmov (!%p157_p10), 2131351028   ;;  %v2396_v48 = vmov (!%p157_p10), 2102212464   ;;  %v2397_v50 = vmov (!%p157_p10), 920167782  }
  0x11   : > { %v2398_v57 = vmov (!%p157_p10), 1326507024   ;;  %s184_s8 = sand.u32 (!%p157_p10), 1, %s2374_s10   ;;  %s2179_s18 = sshll.u32 (!%p157_p10), %s2382_s12, 11 }
  0x12   : > { %s3308_s15 = sshll.u32 (!%p157_p10), %s184_s8, 7  ;;  %s3400_s25 = scalar_lea.hbm (!%p157_p10), %s3458_s2, %s2179_s18 }
  0x13   : > { %s3346_s16 = scalar_lea.vmem (!%p157_p10), [#allocation2], %s3308_s15  ;;  %s2399_s27 = smov (!%p157_p10), [#allocation2]  }
  0x14   : > { %235 = vperm.xlu1 (!%p157_p10), %2277, %v209_v3   ;;  %225 = vperm.xlu0 (!%p157_p10), %2276, %v207_v4   ;;  %s2001_s20 = sshll.u32 (!%p157_p10), %s3346_s16, 4  ;;  %s2316_s28 = sshll.u32 (!%p157_p10), %s2399_s27, 4  ;;  %s3402_s20 = int_to_ptr.vmem [resolvable:$true] %s2001_s20  ;;  %s2317_s28 = int_to_ptr.vmem [resolvable:$false] %s2316_s28 }
  0x15   : > { %s2312_s26 = scalar_lea.vmem (!%p157_p10), %s3402_s20, 2048  ;;  %s2318_s29 = scalar_lea.vmem (!%p157_p10), %s2317_s28, 4096 }
  0x16   : > { %s189_s3 = scalar_select %p188_p11, %s2382_s12, 1 }
  0x17   : > { %s3410_s12 = scalar_lea.sflag [#allocation3], %s184_s8  ;;  %p2313_p12 = scmp.ne.s32.totalorder %s3402_s20, %s2312_s26 }
  0x18   : > { %s2178_s4 = sshll.u32 %s189_s3, 3  ;;  %p2319_p1 = scmp.lt.s32.totalorder %s3402_s20, %s2317_s28 }
  0x19   : > { %s195_s7 = scalar_lea.vmem %s3456_s0, %s2178_s4  ;;  %p2314_p13 = pnand %p2313_p12, %p2457_p4 }
  0x1a   : > { %v205_v5 = vld [vmem:[%s195_s7] sm:$0xff]  ;;  %p2320_p2 = scmp.lt.s32.totalorder %s2318_s29, %s2312_s26 }
  0x1b   : > { %v211_v6 = vcombine.high %v205_v5, %v205_v5  ;;  %v213_v7 = vcombine.low %v205_v5, %v205_v5  ;;  %p2315_p0 = pneg %p2314_p13 }
  0x1c   : > { %p2321_p3 = por %p2320_p2, %p2319_p1 }
  0x1d   : > { %v2490_v8 = vsel %vm215_vm0, %v205_v5, %v213_v7  ;;  %v2493_v9 = vsel %vm215_vm0, %v211_v6, %v205_v5 }
  0x1e   : > { %p2322_p5 = pnand %p2321_p3, %p2315_p0 }
  0x8f   : > { %v221_v10 = vpop.permute.xlu0 %220 }
  0x90   : > { %v2496_v11 = vmul.f32 %v221_v10, %v2490_v8  ;;  %v2499_v12 = vmul.f32 %v221_v10, %v2493_v9 }
  0x92   : > { %v246_v13 = vand.u32 2147483647, %v2496_v11  ;;  %v249_v14 = vand.u32 2139095040, %v2496_v11  ;;  %v350_v16 = vand.u32 2147483647, %v2499_v12  ;;  %v353_v17 = vand.u32 2139095040, %v2499_v12 }
  0x93   : > { %v2503_v15 = vpop.permute.xlu0 %225 }
  0x94   : > { %v2509_v18 = vmul.f32 %v2503_v15, %v2490_v8  ;;  %v250_v19 = vshrl.u32 %v249_v14, 23  ;;  %v354_v20 = vshrl.u32 %v353_v17, 23  ;;  %v253_v21 = vand.u32 8388607, %v246_v13 }
  0x95   : > { %v357_v22 = vand.u32 8388607, %v350_v16 }
  0x96   : > { %v2109_v23 = vadd.s32 4294967169, %v250_v19  ;;  %v2113_v24 = vadd.s32 4294967169, %v354_v20  ;;  %v457_v25 = vand.u32 2139095040, %v2509_v18  ;;  %v254_v28 = vor.u32 8388608, %v253_v21 }
  0x97   : > { %v358_v29 = vor.u32 8388608, %v357_v22 }
  0x98   : > { %v256_v26 = vadd.s32 1, %v2109_v23  ;;  %v360_v27 = vadd.s32 1, %v2113_v24  ;;  %v458_v30 = vshrl.u32 %v457_v25, 23  ;;  %v2516_v36 = vshll.u32 %v254_v28, 8 }
  0x99   : > { %v2520_v38 = vshll.u32 %v358_v29, 8 }
  0x9a   : > { %vm257_vm1 = vcmp.gt.s32.totalorder %v256_v26, 0  ;;  %vm361_vm2 = vcmp.gt.s32.totalorder %v360_v27, 0  ;;  %v2117_v33 = vadd.s32 4294967169, %v458_v30 }
  0x9b   : > { %v258_v31 = vsel %vm257_vm1, %v256_v26, 0  ;;  %v362_v32 = vsel %vm361_vm2, %v360_v27, 0 }
  0x9c   : > { %v259_v34 = vshrl.u32 %v258_v31, 5  ;;  %v260_v35 = vand.u32 31, %v258_v31  ;;  %v2518_v37 = vshrl.u32 %v362_v32, 5  ;;  %v364_v42 = vand.u32 31, %v362_v32 }
  0x9d   : > { %v2523_v43 = vadd.s32 1, %v2117_v33 }
  0x9e   : > { %v261_v39 = vsub.s32 32, %v260_v35  ;;  %v263_v41 = vshll.u32 %v2393_v40, %v260_v35  ;;  %v266_v45 = vshll.u32 %v2394_v44, %v260_v35  ;;  %v269_v47 = vshll.u32 %v2395_v46, %v260_v35 }
  0x9f   : > { %v272_v49 = vshll.u32 %v2396_v48, %v260_v35  ;;  %v275_v51 = vshll.u32 %v2397_v50, %v260_v35  ;;  %vm278_vm3 = vcmp.lt.s32.totalorder %v259_v34, 1  ;;  %vm279_vm4 = vcmp.lt.s32.totalorder %v259_v34, 2 }
  0xa0   : > { %v264_v52 = vshrl.u32 %v2394_v44, %v261_v39  ;;  %v267_v53 = vshrl.u32 %v2395_v46, %v261_v39  ;;  %v270_v54 = vshrl.u32 %v2396_v48, %v261_v39  ;;  %v262_v55 = vshrl.u32 %v2393_v40, %v261_v39 }
  0xa1   : > { %v273_v56 = vshrl.u32 %v2397_v50, %v261_v39  ;;  %v276_v58 = vshrl.u32 %v2398_v57, %v261_v39  ;;  %v365_v62 = vsub.s32 32, %v364_v42  ;;  %vm280_vm5 = vcmp.lt.s32.totalorder %v259_v34, 3 }
  0xa2   : > { %v265_v59 = vor.u32 %v264_v52, %v263_v41  ;;  %v268_v60 = vor.u32 %v267_v53, %v266_v45  ;;  %v271_v61 = vor.u32 %v270_v54, %v269_v47  ;;  %vm281_vm6 = vcmp.lt.s32.totalorder %v259_v34, 4 }
  0xa3   : > { %v274_v63 = vor.u32 %v273_v56, %v272_v49  ;;  %v277_v0 = vor.u32 %v276_v58, %v275_v51  ;;  %v367_v10 = vshll.u32 %v2393_v40, %v364_v42  ;;  %v368_v19 = vshrl.u32 %v2394_v44, %v365_v62 }
  0xa4   : > { %v282_v1 = vsel %vm278_vm3, %v262_v55, %v265_v59  ;;  %v283_v2 = vsel %vm281_vm6, %v271_v61, 2102212464  ;;  %v286_v3 = vsel %vm278_vm3, %v265_v59, %v268_v60  ;;  %v290_v4 = vsel %vm278_vm3, %v268_v60, %v271_v61 }
  0xa5   : > { %v284_v5 = vsel %vm280_vm5, %v268_v60, %v283_v2  ;;  %v287_v6 = vsel %vm281_vm6, %v274_v63, 920167782  ;;  %v291_v7 = vsel %vm281_vm6, %v277_v0, 1326507024  ;;  %v370_v20 = vshll.u32 %v2394_v44, %v364_v42 }
  0xa6   : > { %v288_v14 = vsel %vm280_vm5, %v271_v61, %v287_v6  ;;  %v292_v17 = vsel %vm280_vm5, %v274_v63, %v291_v7  ;;  %v285_v21 = vsel %vm279_vm4, %v282_v1, %v284_v5  ;;  %v371_v24 = vshrl.u32 %v2395_v46, %v365_v62 }
  0xa7   : > { %v289_v22 = vsel %vm279_vm4, %v286_v3, %v288_v14  ;;  %v293_v23 = vsel %vm279_vm4, %v290_v4, %v292_v17  ;;  %v369_v29 = vor.u32 %v368_v19, %v367_v10  ;;  %v373_v31 = vshll.u32 %v2395_v46, %v364_v42 }
  0xa8   : > { %v2546_v25 = vmul.u32.u64.low %v2516_v36, %v293_v23  ;;  %v2547_v26 = vmul.u32.u64.high %v2516_v36, %v293_v23, %v2546_v25  ;;  %v2550_v27 = vmul.u32.u64.low %v2516_v36, %v289_v22  ;;  %v2551_v28 = vmul.u32.u64.high %v2516_v36, %v289_v22, %v2550_v27 }
  0xa9   : > { %v372_v30 = vor.u32 %v371_v24, %v370_v20  ;;  %v374_v32 = vshrl.u32 %v2396_v48, %v365_v62  ;;  %v366_v33 = vshrl.u32 %v2393_v40, %v365_v62  ;;  %v376_v34 = vshll.u32 %v2396_v48, %v364_v42 }
  0xaa   : > { %v377_v35 = vshrl.u32 %v2397_v50, %v365_v62  ;;  %v380_v39 = vshrl.u32 %v2398_v57, %v365_v62  ;;  %v301_v41 = vmul.u32 %v2516_v36, %v285_v21  ;;  %v379_v47 = vshll.u32 %v2397_v50, %v364_v42 }
  0xab   : > { %v375_v45 = vor.u32 %v374_v32, %v373_v31  ;;  %vm382_vm7 = vcmp.lt.s32.totalorder %v2518_v37, 1  ;;  %vm303_vm8 = vc.u32 %v2547_v26, %v2550_v27  ;;  %v304_v49 = vadd.s32 1, %v2551_v28 }
  0xac   : > { %v378_v51 = vor.u32 %v377_v35, %v376_v34  ;;  %vm383_vm9 = vcmp.lt.s32.totalorder %v2518_v37, 2  ;;  %v381_v52 = vor.u32 %v380_v39, %v379_v47  ;;  %vm384_vm10 = vcmp.lt.s32.totalorder %v2518_v37, 3 }
  0xad   : > { %vm385_vm11 = vcmp.lt.s32.totalorder %v2518_v37, 4  ;;  %v390_v53 = vsel %vm382_vm7, %v369_v29, %v372_v30  ;;  %v305_v36 = vsel %vm303_vm8, %v304_v49, %v2551_v28  ;;  %v394_v55 = vsel %vm382_vm7, %v372_v30, %v375_v45 }
  0xae   : > { %v387_v54 = vsel %vm385_vm11, %v375_v45, 2102212464  ;;  %v391_v42 = vsel %vm385_vm11, %v378_v51, 920167782  ;;  %v306_v56 = vadd.s32 %v305_v36, %v301_v41  ;;  %v386_v58 = vsel %vm382_vm7, %v366_v33, %v369_v29 }
  0xaf   : > { %v392_v59 = vsel %vm384_vm10, %v375_v45, %v391_v42  ;;  %v395_v60 = vsel %vm385_vm11, %v381_v52, 1326507024  ;;  %v388_v61 = vsel %vm384_vm10, %v372_v30, %v387_v54  ;;  %vm465_vm12 = vcmp.gt.s32.totalorder %v2523_v43, 0 }
  0xb0   : > { %v393_v62 = vsel %vm383_vm9, %v390_v53, %v392_v59  ;;  %v396_v63 = vsel %vm384_vm10, %v378_v51, %v395_v60  ;;  %v307_v0 = vadd.s32 536870912, %v306_v56  ;;  %v466_v6 = vsel %vm465_vm12, %v2523_v43, 0 }
  0xb1   : > { %v397_v1 = vsel %vm383_vm9, %v394_v55, %v396_v63  ;;  %v2576_v2 = vmul.u32.u64.low %v2520_v38, %v393_v62  ;;  %v2577_v3 = vmul.u32.u64.high %v2520_v38, %v393_v62, %v2576_v2  ;;  %v389_v10 = vsel %vm383_vm9, %v386_v58, %v388_v61 }
  0xb2   : > { %v2581_v4 = vmul.u32.u64.low %v2520_v38, %v397_v1  ;;  %v2582_v5 = vmul.u32.u64.high %v2520_v38, %v397_v1, %v2581_v4  ;;  %v2585_v7 = vshrl.u32 %v307_v0, 30  ;;  %v468_v14 = vand.u32 31, %v466_v6 }
  0xb3   : > { %v408_v19 = vadd.s32 1, %v2577_v3  ;;  %v405_v20 = vmul.u32 %v2520_v38, %v389_v10  ;;  %v2596_v22 = vmul.f32 %v2503_v15, %v2493_v9  ;;  %v454_v23 = vand.u32 2147483647, %v2509_v18 }
  0xb4   : > { %v309_v17 = vshll.u32 %v2585_v7, 30  ;;  %vm407_vm13 = vc.u32 %v2582_v5, %v2576_v2  ;;  %v469_v21 = vsub.s32 32, %v468_v14  ;;  %v471_v34 = vshll.u32 %v2393_v40, %v468_v14 }
  0xb5   : > { %v409_v37 = vsel %vm407_vm13, %v408_v19, %v2577_v3  ;;  %v461_v15 = vand.u32 8388607, %v454_v23  ;;  %v561_v32 = vand.u32 2139095040, %v2596_v22  ;;  %v474_v35 = vshll.u32 %v2394_v44, %v468_v14 }
  0xb6   : > { %v2598_v43 = vsub.s32 %v306_v56, %v309_v17  ;;  %v410_v24 = vadd.s32 %v409_v37, %v405_v20  ;;  %v472_v38 = vshrl.u32 %v2394_v44, %v469_v21  ;;  %v475_v29 = vshrl.u32 %v2395_v46, %v469_v21 }
  0xb7   : > { %v481_v31 = vshrl.u32 %v2397_v50, %v469_v21  ;;  %v478_v39 = vshrl.u32 %v2396_v48, %v469_v21  ;;  %v467_v45 = vshrl.u32 %v466_v6, 5  ;;  %v480_v47 = vshll.u32 %v2396_v48, %v468_v14 }
  0xb8   : > { %v312_v25 = vsub.s32 0, %v2598_v43  ;;  %v411_v28 = vadd.s32 536870912, %v410_v24  ;;  %v484_v49 = vshrl.u32 %v2398_v57, %v469_v21  ;;  %v473_v52 = vor.u32 %v472_v38, %v471_v34 }
  0xb9   : > { %v476_v53 = vor.u32 %v475_v29, %v474_v35  ;;  %v477_v36 = vshll.u32 %v2395_v46, %v468_v14  ;;  %v482_v42 = vor.u32 %v481_v31, %v480_v47  ;;  %v483_v55 = vshll.u32 %v2397_v50, %v468_v14  ;;  %v231_v35 = vpop.permute.xlu1 %230 }
  0xba   : > { %v2110_v30 = vmin.u32 %v312_v25, %v2598_v43  ;;  %v2610_v33 = vshrl.u32 %v411_v28, 30  ;;  %v462_v58 = vor.u32 8388608, %v461_v15  ;;  %vm486_vm15 = vcmp.lt.s32.totalorder %v467_v45, 1 }
  0xbb   : > { %v479_v59 = vor.u32 %v478_v39, %v477_v36  ;;  %v485_v60 = vor.u32 %v484_v49, %v483_v55  ;;  %v562_v61 = vshrl.u32 %v561_v32, 23  ;;  %vm489_vm1 = vcmp.lt.s32.totalorder %v467_v45, 4 }
  0xbc   : > { %v314_v41 = vclz %v2110_v30  ;;  %v413_v51 = vshll.u32 %v2610_v33, 30  ;;  %v494_v0 = vsel %vm486_vm15, %v473_v52, %v476_v53  ;;  %v470_v3 = vshrl.u32 %v2393_v40, %v469_v21 }
  0xbd   : > { %vm488_vm2 = vcmp.lt.s32.totalorder %v467_v45, 3  ;;  %v495_v4 = vsel %vm489_vm1, %v482_v42, 920167782  ;;  %vm487_vm3 = vcmp.lt.s32.totalorder %v467_v45, 2  ;;  %v491_v10 = vsel %vm489_vm1, %v479_v59, 2102212464 }
  0xbe   : > { %v2111_v54 = vadd.s32 4294967294, %v314_v41  ;;  %v2620_v56 = vsub.s32 %v410_v24, %v413_v51  ;;  %v496_v14 = vsel %vm488_vm2, %v479_v59, %v495_v4  ;;  %v498_v20 = vsel %vm486_vm15, %v476_v53, %v479_v59 }
  0xbf   : > { %v497_v19 = vsel %vm487_vm3, %v494_v0, %v496_v14  ;;  %v499_v37 = vsel %vm489_vm1, %v485_v60, 1326507024  ;;  %v502_v25 = vshll.u32 %v462_v58, 8  ;;  %v2121_v28 = vadd.s32 4294967169, %v562_v61 }
  0xc0   : > { %vm2112_vm14 = vcmp.lt.s32.totalorder %v2111_v54, 0  ;;  %v416_v63 = vsub.s32 0, %v2620_v56  ;;  %v490_v21 = vsel %vm486_vm15, %v470_v3, %v473_v52  ;;  %v492_v29 = vsel %vm488_vm2, %v476_v53, %v491_v10 }
  0xc1   : > { %v317_v62 = vsel %vm2112_vm14, 0, %v2111_v54  ;;  %v500_v30 = vsel %vm488_vm2, %v482_v42, %v499_v37  ;;  %v2633_v32 = vmul.u32.u64.low %v502_v25, %v497_v19  ;;  %v2634_v34 = vmul.u32.u64.high %v502_v25, %v497_v19, %v2633_v32 }
  0xc2   : > { %v322_v1 = vsub.s32 4294967266, %v317_v62  ;;  %v2114_v6 = vmin.u32 %v416_v63, %v2620_v56  ;;  %v318_v38 = vsub.s32 32, %v317_v62  ;;  %v501_v31 = vsel %vm487_vm3, %v498_v20, %v500_v30  ;;  %v2653_v63 = vpop.permute.xlu1 %235 }
  0xc3   : > { %v302_v39 = vadd.s32 %v2550_v27, %v2547_v26  ;;  %v2639_v47 = vmul.u32.u64.low %v502_v25, %v501_v31  ;;  %v2640_v49 = vmul.u32.u64.high %v502_v25, %v501_v31, %v2639_v47  ;;  %v493_v51 = vsel %vm487_vm3, %v490_v21, %v492_v29 }
  0xc4   : > { %v323_v17 = vadd.s32 127, %v322_v1  ;;  %v418_v24 = vclz %v2114_v6  ;;  %v558_v52 = vand.u32 2147483647, %v2596_v22  ;;  %v568_v53 = vadd.s32 1, %v2121_v28 }
  0xc5   : > { %v320_v36 = vshrl.u32 %v302_v39, %v318_v38  ;;  %v319_v42 = vshll.u32 %v2598_v43, %v317_v62  ;;  %v512_v58 = vadd.s32 1, %v2634_v34  ;;  %v509_v60 = vmul.u32 %v502_v25, %v493_v51 }
  0xc6   : > { %v2115_v15 = vadd.s32 4294967294, %v418_v24  ;;  %v324_v41 = vshll.u32 %v323_v17, 23  ;;  %vm511_vm5 = vc.u32 %v2640_v49, %v2633_v32  ;;  %vm569_vm6 = vcmp.gt.s32.totalorder %v568_v53, 0 }
  0xc7   : > { %v513_v27 = vsel %vm511_vm5, %v512_v58, %v2634_v34  ;;  %v2651_v45 = vand.u32 8388607, %v558_v52  ;;  %v570_v61 = vsel %vm569_vm6, %v568_v53, 0  ;;  %v321_v43 = vor.u32 %v320_v36, %v319_v42 }
  0xc8   : > { %vm2116_vm4 = vcmp.lt.s32.totalorder %v2115_v15, 0  ;;  %v325_v59 = vor.u32 4788187, %v324_v41  ;;  %v514_v0 = vadd.s32 %v513_v27, %v509_v60  ;;  %v572_v1 = vand.u32 31, %v570_v61 }
  0xc9   : > { %v421_v54 = vsel %vm2116_vm4, 0, %v2115_v15  ;;  %v2656_v3 = vmul.f32 %v231_v35, %v2490_v8  ;;  %v332_v4 = vsub.s32 4, %v2585_v7  ;;  %v406_v6 = vadd.s32 %v2576_v2, %v2582_v5 }
  0xca   : > { %v426_v55 = vsub.s32 4294967266, %v421_v54  ;;  %v422_v62 = vsub.s32 32, %v421_v54  ;;  %v326_v10 = vand.u32 2147483647, %v325_v59  ;;  %v515_v17 = vadd.s32 536870912, %v514_v0 }
  0xcb   : > { %v573_v19 = vsub.s32 32, %v572_v1  ;;  %v2662_v20 = vmul.f32 %v231_v35, %v2493_v9  ;;  %v2666_v37 = vmul.f32 %v2653_v63, %v2490_v8  ;;  %vm2670_vm7 = vcmp.le.f32.partialorder %v246_v13, 0.7853982 }
  0xcc   : > { %v427_v26 = vadd.s32 127, %v426_v55  ;;  %vm248_vm8 = vcmp.lt.s32.totalorder %v2496_v11, 0  ;;  %v328_v2 = vcvt.s32.f32 %v321_v43  ;;  %vm352_vm9 = vcmp.lt.s32.totalorder %v2499_v12, 0 }
  0xcd   : > { %v424_v5 = vshrl.u32 %v406_v6, %v422_v62  ;;  %v2676_v25 = vshrl.u32 %v515_v17, 30  ;;  %v566_v28 = vor.u32 8388608, %v2651_v45  ;;  %v333_v8 = vsel %vm248_vm8, %v332_v4, %v2585_v7 }
  0xce   : > { %v428_v14 = vshll.u32 %v427_v26, 23  ;;  %v423_v38 = vshll.u32 %v2620_v56, %v421_v54  ;;  %v436_v13 = vsub.s32 4, %v2610_v33  ;;  %v665_v21 = vand.u32 2139095040, %v2656_v3 }
  0xcf   : > { %v329_v29 = vmul.f32 %v328_v2, %v326_v10  ;;  %v517_v15 = vshll.u32 %v2676_v25, 30  ;;  %v576_v31 = vshrl.u32 %v2394_v44, %v573_v19  ;;  %v579_v34 = vshrl.u32 %v2395_v46, %v573_v19 }
  0xd0   : > { %v429_v30 = vor.u32 4788187, %v428_v14  ;;  %v582_v35 = vshrl.u32 %v2396_v48, %v573_v19  ;;  %v584_v39 = vshll.u32 %v2396_v48, %v572_v1  ;;  %v585_v7 = vshrl.u32 %v2397_v50, %v573_v19 }
  0xd1   : > { %v425_v41 = vor.u32 %v424_v5, %v423_v38  ;;  %v2691_v56 = vsub.s32 %v514_v0, %v517_v15  ;;  %v571_v47 = vshrl.u32 %v570_v61, 5  ;;  %v575_v51 = vshll.u32 %v2393_v40, %v572_v1 }
  0xd2   : > { %v578_v53 = vshll.u32 %v2394_v44, %v572_v1  ;;  %v581_v36 = vshll.u32 %v2395_v46, %v572_v1  ;;  %v586_v54 = vor.u32 %v585_v7, %v584_v39  ;;  %v588_v42 = vshrl.u32 %v2398_v57, %v573_v19 }
  0xd3   : > { %v430_v55 = vand.u32 2147483647, %v429_v30  ;;  %v520_v58 = vsub.s32 0, %v2691_v56  ;;  %v662_v59 = vand.u32 2147483647, %v2656_v3  ;;  %v666_v60 = vshrl.u32 %v665_v21, 23 }
  0xd4   : > { %v577_v26 = vor.u32 %v576_v31, %v575_v51  ;;  %v580_v27 = vor.u32 %v579_v34, %v578_v53  ;;  %v583_v45 = vor.u32 %v582_v35, %v581_v36  ;;  %v587_v61 = vshll.u32 %v2397_v50, %v572_v1 }
  0xd5   : > { %v330_v43 = vxor.u32 2147483648, %v329_v29  ;;  %v2702_v62 = vsel %vm2670_vm7, 0, %v333_v8  ;;  %v2118_v0 = vmin.u32 %v520_v58, %v2691_v56  ;;  %vm593_vm10 = vcmp.lt.s32.totalorder %v571_v47, 4 }
  0xd6   : > { %v432_v4 = vcvt.s32.f32 %v425_v41  ;;  %v437_v6 = vsel %vm352_vm9, %v436_v13, %v2610_v33  ;;  %v589_v10 = vor.u32 %v588_v42, %v587_v61  ;;  %v599_v14 = vsel %vm593_vm10, %v586_v54, 920167782 }
  0xd7   : > { %v522_v17 = vclz %v2118_v0  ;;  %vm590_vm11 = vcmp.lt.s32.totalorder %v571_v47, 1  ;;  %vm592_vm12 = vcmp.lt.s32.totalorder %v571_v47, 3  ;;  %v2125_v1 = vadd.s32 4294967169, %v666_v60 }
  0xd8   : > { %vm2711_vm13 = vcmp.le.f32.partialorder %v350_v16, 0.7853982  ;;  %v433_v5 = vmul.f32 %v432_v4, %v430_v55  ;;  %v598_v8 = vsel %vm590_vm11, %v577_v26, %v580_v27  ;;  %v600_v38 = vsel %vm592_vm12, %v583_v45, %v599_v14 }
  0xd9   : > { %v606_v21 = vshll.u32 %v566_v28, 8  ;;  %v331_v33 = vsel %vm248_vm8, %v330_v43, %v329_v29  ;;  %v510_v13 = vadd.s32 %v2633_v32, %v2640_v49  ;;  %v2119_v30 = vadd.s32 4294967294, %v522_v17 }
  0xda   : > { %v574_v15 = vshrl.u32 %v2393_v40, %v573_v19  ;;  %vm591_vm14 = vcmp.lt.s32.totalorder %v571_v47, 2  ;;  %v595_v16 = vsel %vm593_vm10, %v583_v45, 2102212464  ;;  %v602_v31 = vsel %vm590_vm11, %v580_v27, %v583_v45 }
  0xdb   : > { %v603_v34 = vsel %vm593_vm10, %v589_v10, 1326507024  ;;  %vm2120_vm15 = vcmp.lt.s32.totalorder %v2119_v30, 0  ;;  %v601_v35 = vsel %vm591_vm14, %v598_v8, %v600_v38  ;;  %v672_v39 = vadd.s32 1, %v2125_v1 }
  0xdc   : > { %v604_v28 = vsel %vm592_vm12, %v586_v54, %v603_v34  ;;  %v334_v32 = vsel %vm2670_vm7, %v2496_v11, %v331_v33  ;;  %v434_v49 = vxor.u32 2147483648, %v433_v5  ;;  %v525_v29 = vsel %vm2120_vm15, 0, %v2119_v30 }
  0xdd   : > { %v605_v19 = vsel %vm591_vm14, %v602_v31, %v604_v28  ;;  %v526_v7 = vsub.s32 32, %v525_v29  ;;  %v530_v41 = vsub.s32 4294967266, %v525_v29  ;;  %v594_v51 = vsel %vm590_vm11, %v574_v15, %v577_v26 }
  0xde   : > { %v596_v53 = vsel %vm592_vm12, %v580_v27, %v595_v16  ;;  %v2733_v36 = vmul.u32.u64.low %v606_v21, %v605_v19  ;;  %v2734_v42 = vmul.u32.u64.high %v606_v21, %v605_v19, %v2733_v36  ;;  %v527_v24 = vshll.u32 %v2691_v56, %v525_v29 }
  0xdf   : > { %v2736_v55 = vmul.u32.u64.low %v606_v21, %v601_v35  ;;  %v2737_v54 = vmul.u32.u64.high %v606_v21, %v601_v35, %v2736_v55  ;;  %v528_v58 = vshrl.u32 %v510_v13, %v526_v7  ;;  %v531_v60 = vadd.s32 127, %v530_v41 }
  0xe0   : > { %vm673_vm1 = vcmp.gt.s32.totalorder %v672_v39, 0  ;;  %v339_v45 = vadd.s32 3, %v2702_v62  ;;  %v435_v61 = vsel %vm352_vm9, %v434_v49, %v433_v5  ;;  %v597_v26 = vsel %vm591_vm14, %v594_v51, %v596_v53 }
  0xe1   : > { %v674_v27 = vsel %vm673_vm1, %v672_v39, 0  ;;  %v2747_v43 = vmul.f32 %v2653_v63, %v2493_v9  ;;  %v2751_v0 = vsel %vm2711_vm13, 0, %v437_v6  ;;  %v529_v56 = vor.u32 %v528_v58, %v527_v24 }
  0xe2   : > { %v532_v4 = vshll.u32 %v531_v60, 23  ;;  %2280 = vcosq.f32 %v334_v32  ;;  %vm615_vm2 = vc.u32 %v2734_v42, %v2736_v55  ;;  %v616_v10 = vadd.s32 1, %v2737_v54 }
  0xe3   : > { %v669_v47 = vand.u32 8388607, %v662_v59  ;;  %v438_v9 = vsel %vm2711_vm13, %v2499_v12, %v435_v61  ;;  %v613_v14 = vmul.u32 %v606_v21, %v597_v26  ;;  %v676_v17 = vand.u32 31, %v674_v27 }
  0xe4   : > { %v533_v63 = vor.u32 4788187, %v532_v4  ;;  %2282 = vsinq.f32 %v334_v32  ;;  %v2761_v6 = vand.u32 3, %v339_v45  ;;  %vm456_vm3 = vcmp.lt.s32.totalorder %v2509_v18, 0 }
  0xe5   : > { %v617_v1 = vsel %vm615_vm2, %v616_v10, %v2737_v54  ;;  %v536_v8 = vcvt.s32.f32 %v529_v56  ;;  %v677_v33 = vsub.s32 32, %v676_v17  ;;  %2284 = vcosq.f32 %v438_v9 }
  0xe6   : > { %v534_v5 = vand.u32 2147483647, %v533_v63  ;;  %v618_v38 = vadd.s32 %v617_v1, %v613_v14  ;;  %v443_v13 = vadd.s32 3, %v2751_v0  ;;  %v540_v2 = vsub.s32 4, %v2676_v25 }
  0xe7   : > { %v670_v30 = vor.u32 8388608, %v669_v47  ;;  %v679_v16 = vshll.u32 %v2393_v40, %v676_v17  ;;  %v680_v31 = vshrl.u32 %v2394_v44, %v677_v33  ;;  %v682_v34 = vshll.u32 %v2394_v44, %v676_v17 }
  0xe8   : > { %v537_v15 = vmul.f32 %v536_v8, %v534_v5  ;;  %v619_v21 = vadd.s32 536870912, %v618_v38  ;;  %v683_v35 = vshrl.u32 %v2395_v46, %v677_v33  ;;  %v686_v28 = vshrl.u32 %v2396_v48, %v677_v33 }
  0xe9   : > { %v689_v39 = vshrl.u32 %v2397_v50, %v677_v33  ;;  %v675_v49 = vshrl.u32 %v674_v27, 5  ;;  %v685_v29 = vshll.u32 %v2395_v46, %v676_v17  ;;  %v688_v19 = vshll.u32 %v2396_v48, %v676_v17 }
  0xea   : > { %v2773_v32 = vshrl.u32 %v619_v21, 30  ;;  %v681_v7 = vor.u32 %v680_v31, %v679_v16  ;;  %v684_v41 = vor.u32 %v683_v35, %v682_v34  ;;  %v691_v51 = vshll.u32 %v2397_v50, %v676_v17 }
  0xeb   : > { %v692_v53 = vshrl.u32 %v2398_v57, %v677_v33  ;;  %2286 = vsinq.f32 %v438_v9  ;;  %v538_v36 = vxor.u32 2147483648, %v537_v15  ;;  %v690_v24 = vor.u32 %v689_v39, %v688_v19 }
  0xec   : > { %v621_v54 = vshll.u32 %v2773_v32, 30  ;;  %v2780_v58 = vpop.eup %2280  ;;  %v2782_v60 = vand.u32 3, %v443_v13  ;;  %vm2786_vm4 = vcmp.le.f32.partialorder %v454_v23, 0.7853982  ;;  %v687_v61 = vor.u32 %v686_v28, %v685_v29 }
  0xed   : > { %v693_v26 = vor.u32 %v692_v53, %v691_v51  ;;  %v541_v27 = vsel %vm456_vm3, %v540_v2, %v2676_v25  ;;  %vm694_vm5 = vcmp.lt.s32.totalorder %v675_v49, 1  ;;  %v2795_v4 = vshll.u32 %v670_v30, 8 }
  0xee   : > { %v2793_v56 = vsub.s32 %v618_v38, %v621_v54  ;;  %v2797_v10 = vpop.eup %2282  ;;  %vm345_vm6 = vcmp.eq.s32.totalorder %v2761_v6, 2  ;;  %vm695_vm7 = vcmp.lt.s32.totalorder %v675_v49, 2  ;;  %vm697_vm8 = vcmp.lt.s32.totalorder %v675_v49, 4 }
  0xef   : > { %v702_v23 = vsel %vm694_vm5, %v681_v7, %v684_v41  ;;  %v769_v47 = vand.u32 2139095040, %v2662_v20  ;;  %v539_v9 = vsel %vm456_vm3, %v538_v36, %v537_v15  ;;  %vm696_vm9 = vcmp.lt.s32.totalorder %v675_v49, 3  ;;  %v2805_v14 = vpop.eup %2284 }
  0xf0   : > { %v624_v25 = vsub.s32 0, %v2793_v56  ;;  %v703_v63 = vsel %vm697_vm8, %v690_v24, 920167782  ;;  %v699_v17 = vsel %vm697_vm8, %v687_v61, 2102212464  ;;  %v706_v5 = vsel %vm694_vm5, %v684_v41, %v687_v61 }
  0xf1   : > { %v704_v1 = vsel %vm696_vm9, %v687_v61, %v703_v63  ;;  %v707_v8 = vsel %vm697_vm8, %v693_v26, 1326507024  ;;  %vm560_vm10 = vcmp.lt.s32.totalorder %v2596_v22, 0  ;;  %v678_v13 = vshrl.u32 %v2393_v40, %v677_v33 }
  0xf2   : > { %v2122_v38 = vmin.u32 %v624_v25, %v2793_v56  ;;  %v705_v2 = vsel %vm695_vm7, %v702_v23, %v704_v1  ;;  %v708_v30 = vsel %vm696_vm9, %v690_v24, %v707_v8  ;;  %v542_v15 = vsel %vm2786_vm4, %v2509_v18, %v539_v9 }
  0xf3   : > { %v709_v21 = vsel %vm695_vm7, %v706_v5, %v708_v30  ;;  %v2819_v16 = vmul.u32.u64.low %v2795_v4, %v705_v2  ;;  %v2820_v31 = vmul.u32.u64.high %v2795_v4, %v705_v2, %v2819_v16  ;;  %vm342_vm11 = vcmp.eq.s32.totalorder %v2761_v6, 0 }
  0xf4   : > { %v3462_v34 = vxor.u32 2147483648, %v2780_v58  ;;  %v626_v33 = vclz %v2122_v38  ;;  %v698_v35 = vsel %vm694_vm5, %v678_v13, %v681_v7  ;;  %v700_v28 = vsel %vm696_vm9, %v684_v41, %v699_v17 }
  0xf5   : > { %vm446_vm12 = vcmp.eq.s32.totalorder %v2782_v60, 0  ;;  %v2830_v39 = vsel %vm2786_vm4, 0, %v541_v27  ;;  %v2833_v29 = vmul.u32.u64.low %v2795_v4, %v709_v21  ;;  %v2834_v19 = vmul.u32.u64.high %v2795_v4, %v709_v21, %v2833_v29  ;;  %v2836_v53 = vpop.eup %2286 }
  0xf6   : > { %v770_v51 = vshrl.u32 %v769_v47, 23  ;;  %vm449_vm13 = vcmp.eq.s32.totalorder %v2782_v60, 2  ;;  %2288 = vcosq.f32 %v542_v15  ;;  %vm2841_vm14 = vcmp.le.f32.partialorder %v558_v52, 0.7853982 }
  0xf7   : > { %v2123_v41 = vadd.s32 4294967294, %v626_v33  ;;  %v644_v36 = vsub.s32 4, %v2773_v32  ;;  %2290 = vsinq.f32 %v542_v15  ;;  %v701_v54 = vsel %vm695_vm7, %v698_v35, %v700_v28 }
  0xf8   : > { %v720_v24 = vadd.s32 1, %v2820_v31  ;;  %v2129_v45 = vadd.s32 4294967169, %v770_v51  ;;  %vm341_vm15 = vcmp.lt.s32.totalorder %v2761_v6, 2  ;;  %v3463_v61 = vxor.u32 2147483648, %v2797_v10 }
  0xf9   : > { %v347_v52 = vsel %vm345_vm6, %v3462_v34, %v2797_v10  ;;  %v547_v26 = vadd.s32 3, %v2830_v39  ;;  %vm2124_vm1 = vcmp.lt.s32.totalorder %v2123_v41, 0  ;;  %v3460_v27 = vxor.u32 2147483648, %v2836_v53 }
  0xfa   : > { %v3459_v49 = vxor.u32 2147483648, %v2805_v14  ;;  %v629_v23 = vsel %vm2124_vm1, 0, %v2123_v41  ;;  %vm719_vm2 = vc.u32 %v2834_v19, %v2819_v16  ;;  %v614_v47 = vadd.s32 %v2736_v55, %v2734_v42 }
  0xfb   : > { %v630_v9 = vsub.s32 32, %v629_v23  ;;  %v634_v25 = vsub.s32 4294967266, %v629_v23  ;;  %v717_v63 = vmul.u32 %v2795_v4, %v701_v54  ;;  %v645_v17 = vsel %vm560_vm10, %v644_v36, %v2773_v32 }
  0xfc   : > { %v721_v1 = vsel %vm719_vm2, %v720_v24, %v2820_v31  ;;  %v3464_v5 = vand.u32 2147483647, %v2662_v20  ;;  %v776_v8 = vadd.s32 1, %v2129_v45  ;;  %v631_v38 = vshll.u32 %v2793_v56, %v629_v23 }
  0xfd   : > { %v632_v13 = vshrl.u32 %v614_v47, %v630_v9  ;;  %v635_v2 = vadd.s32 127, %v634_v25  ;;  %v722_v30 = vadd.s32 %v721_v1, %v717_v63  ;;  %v344_v42 = vsel %vm342_vm11, %v2780_v58, %v3463_v61 }
  0xfe   : > { %v451_v55 = vsel %vm449_vm13, %v3459_v49, %v2836_v53  ;;  %vm777_vm3 = vcmp.gt.s32.totalorder %v776_v8, 0  ;;  %v873_v32 = vand.u32 2139095040, %v2666_v37  ;;  %v448_v56 = vsel %vm446_vm12, %v2805_v14, %v3460_v27 }
  0xff   : > { %v633_v4 = vor.u32 %v632_v13, %v631_v38  ;;  %v636_v15 = vshll.u32 %v635_v2, 23  ;;  %v723_v21 = vadd.s32 536870912, %v722_v30  ;;  %v2887_v31 = vsel %vm2841_vm14, 0, %v645_v17 }
 0x100   : > { %v773_v33 = vand.u32 8388607, %v3464_v5  ;;  %v778_v35 = vsel %vm777_vm3, %v776_v8, 0  ;;  %v3461_v28 = vand.u32 2147483647, %v2666_v37  ;;  %v2892_v29 = vpop.eup %2288  ;;  %vm445_vm4 = vcmp.lt.s32.totalorder %v2782_v60, 2 }
 0x101   : > { %v2895_v51 = vand.u32 3, %v547_v26  ;;  %v637_v41 = vor.u32 4788187, %v636_v15  ;;  %v2897_v36 = vshrl.u32 %v723_v21, 30  ;;  %v2899_v54 = vpop.eup %2290  ;;  %v2903_v24 = vsel %vm341_vm15, %v344_v42, %v347_v52 }
 0x102   : > { %v2905_v45 = vsel %vm445_vm4, %v448_v56, %v451_v55  ;;  %v780_v23 = vand.u32 31, %v778_v35  ;;  %v874_v47 = vshrl.u32 %v873_v32, 23  ;;  %v640_v25 = vcvt.s32.f32 %v633_v4 }
 0x103   : > { %v638_v9 = vand.u32 2147483647, %v637_v41  ;;  %v2908_v63 = vadd.s32 3, %v2887_v31  ;;  %v725_v60 = vshll.u32 %v2897_v36, 30  ;;  %v3465_v26 = vxor.u32 2147483648, %v2892_v29 }
 0x104   : > { %v774_v17 = vor.u32 8388608, %v773_v33  ;;  %v781_v1 = vsub.s32 32, %v780_v23  ;;  %v2914_v6 = vand.u32 8388607, %v3461_v28  ;;  %v3466_v52 = vxor.u32 2147483648, %v2899_v54 }
 0x105   : > { %v641_v8 = vmul.f32 %v640_v25, %v638_v9  ;;  %v718_v38 = vadd.s32 %v2819_v16, %v2834_v19  ;;  %v2919_v13 = vsub.s32 %v722_v30, %v725_v60  ;;  %v783_v2 = vshll.u32 %v2393_v40, %v780_v23 }
 0x106   : > { %v784_v42 = vshrl.u32 %v2394_v44, %v781_v1  ;;  %v787_v55 = vshrl.u32 %v2395_v46, %v781_v1  ;;  %v2133_v32 = vadd.s32 4294967169, %v874_v47  ;;  %v786_v15 = vshll.u32 %v2394_v44, %v780_v23 }
 0x107   : > { %v642_v56 = vxor.u32 2147483648, %v641_v8  ;;  %v728_v4 = vsub.s32 0, %v2919_v13  ;;  %v790_v21 = vshrl.u32 %v2396_v48, %v781_v1  ;;  %v779_v33 = vshrl.u32 %v778_v35, 5 }
 0x108   : > { %v789_v41 = vshll.u32 %v2395_v46, %v780_v23  ;;  %v792_v16 = vshll.u32 %v2396_v48, %v780_v23  ;;  %v793_v19 = vshrl.u32 %v2397_v50, %v781_v1  ;;  %v785_v47 = vor.u32 %v784_v42, %v783_v2 }
 0x109   : > { %v643_v30 = vsel %vm560_vm10, %v642_v56, %v641_v8  ;;  %v2126_v9 = vmin.u32 %v728_v4, %v2919_v13  ;;  %v788_v25 = vor.u32 %v787_v55, %v786_v15  ;;  %v795_v27 = vshll.u32 %v2397_v50, %v780_v23 }
 0x10a   : > { %v791_v60 = vor.u32 %v790_v21, %v789_v41  ;;  %v794_v49 = vor.u32 %v793_v19, %v792_v16  ;;  %v796_v28 = vshrl.u32 %v2398_v57, %v781_v1  ;;  %vm553_vm5 = vcmp.eq.s32.totalorder %v2895_v51, 2 }
 0x10b   : > { %v730_v35 = vclz %v2126_v9  ;;  %v748_v34 = vsub.s32 4, %v2897_v36  ;;  %v2937_v61 = vshll.u32 %v774_v17, 8  ;;  %v880_v5 = vadd.s32 1, %v2133_v32 }
 0x10c   : > { %v646_v8 = vsel %vm2841_vm14, %v2596_v22, %v643_v30  ;;  %vm664_vm6 = vcmp.lt.s32.totalorder %v2656_v3, 0  ;;  %v782_v2 = vshrl.u32 %v2393_v40, %v781_v1  ;;  %v797_v42 = vor.u32 %v796_v28, %v795_v27 }
 0x10d   : > { %vm798_vm7 = vcmp.lt.s32.totalorder %v779_v33, 1  ;;  %vm550_vm8 = vcmp.eq.s32.totalorder %v2895_v51, 0  ;;  %v2127_v23 = vadd.s32 4294967294, %v730_v35  ;;  %vm800_vm9 = vcmp.lt.s32.totalorder %v779_v33, 3 }
 0x10e   : > { %vm801_vm10 = vcmp.lt.s32.totalorder %v779_v33, 4  ;;  %v806_v55 = vsel %vm798_vm7, %v785_v47, %v788_v25  ;;  %vm338_vm11 = vweird.f32 %v2496_v11  ;;  %v810_v7 = vsel %vm798_vm7, %v788_v25, %v791_v60 }
 0x10f   : > { %v803_v17 = vsel %vm801_vm10, %v791_v60, 2102212464  ;;  %v807_v32 = vsel %vm801_vm10, %v794_v49, 920167782  ;;  %v811_v56 = vsel %vm801_vm10, %v797_v42, 1326507024  ;;  %vm442_vm12 = vweird.f32 %v2499_v12 }
 0x110   : > { %vm2951_vm13 = vcmp.le.f32.partialorder %v662_v59, 0.7853982  ;;  %vm2128_vm14 = vcmp.lt.s32.totalorder %v2127_v23, 0  ;;  %vm799_vm15 = vcmp.lt.s32.totalorder %v779_v33, 2  ;;  %v808_v28 = vsel %vm800_vm9, %v791_v60, %v807_v32 }
 0x111   : > { %v812_v1 = vsel %vm800_vm9, %v794_v49, %v811_v56  ;;  %vm549_vm1 = vcmp.lt.s32.totalorder %v2895_v51, 2  ;;  %2292 = vcosq.f32 %v646_v8  ;;  %v733_v4 = vsel %vm2128_vm14, 0, %v2127_v23 }
 0x112   : > { %v809_v15 = vsel %vm799_vm15, %v806_v55, %v808_v28  ;;  %v813_v21 = vsel %vm799_vm15, %v810_v7, %v812_v1  ;;  %v734_v41 = vsub.s32 32, %v733_v4  ;;  %v738_v16 = vsub.s32 4294967266, %v733_v4 }
 0x113   : > { %v802_v59 = vsel %vm798_vm7, %v782_v2, %v785_v47  ;;  %v804_v19 = vsel %vm800_vm9, %v788_v25, %v803_v17  ;;  %v2963_v30 = vmul.u32.u64.low %v2937_v61, %v813_v21  ;;  %v2964_v9 = vmul.u32.u64.high %v2937_v61, %v813_v21, %v2963_v30 }
 0x114   : > { %v2967_v49 = vmul.u32.u64.low %v2937_v61, %v809_v15  ;;  %v2968_v60 = vmul.u32.u64.high %v2937_v61, %v809_v15, %v2967_v49  ;;  %v735_v35 = vshll.u32 %v2919_v13, %v733_v4  ;;  %v736_v42 = vshrl.u32 %v718_v38, %v734_v41 }
 0x115   : > { %v739_v23 = vadd.s32 127, %v738_v16  ;;  %vm881_vm2 = vcmp.gt.s32.totalorder %v880_v5, 0  ;;  %v555_v47 = vsel %vm553_vm5, %v3465_v26, %v2899_v54  ;;  %2294 = vsinq.f32 %v646_v8 }
 0x116   : > { %v805_v25 = vsel %vm799_vm15, %v802_v59, %v804_v19  ;;  %v882_v2 = vsel %vm881_vm2, %v880_v5, 0  ;;  %v737_v55 = vor.u32 %v736_v42, %v735_v35  ;;  %v749_v32 = vsel %vm664_vm6, %v748_v34, %v2897_v36 }
 0x117   : > { %v740_v17 = vshll.u32 %v739_v23, 23  ;;  %v884_v13 = vand.u32 31, %v882_v2  ;;  %v552_v38 = vsel %vm550_vm8, %v2892_v29, %v3466_v52  ;;  %vm823_vm3 = vc.u32 %v2964_v9, %v2967_v49 }
 0x118   : > { %v824_v33 = vadd.s32 1, %v2968_v60  ;;  %v878_v5 = vor.u32 8388608, %v2914_v6  ;;  %v2993_v8 = vsel %vm338_vm11, nan, %v2903_v24  ;;  %v821_v36 = vmul.u32 %v2937_v61, %v805_v25 }
 0x119   : > { %v741_v34 = vor.u32 4788187, %v740_v17  ;;  %v885_v7 = vsub.s32 32, %v884_v13  ;;  %v2999_v56 = vsel %vm442_vm12, nan, %v2905_v45  ;;  %v3002_v28 = vand.u32 3, %v2908_v63 }
 0x11a   : > { %v3006_v6 = vsel %vm2951_vm13, 0, %v749_v32  ;;  %v825_v1 = vsel %vm823_vm3, %v824_v33, %v2968_v60  ;;  %v3011_v24 = vsel %vm549_vm1, %v552_v38, %v555_v47  ;;  %v744_v4 = vcvt.s32.f32 %v737_v55 }
 0x11b   : > { %v742_v61 = vand.u32 2147483647, %v741_v34  ;;  %v826_v15 = vadd.s32 %v825_v1, %v821_v36  ;;  %v3013_v21 = vpop.eup %2292  ;;  %v888_v45 = vshrl.u32 %v2394_v44, %v885_v7  ;;  %v891_v63 = vshrl.u32 %v2395_v46, %v885_v7 }
 0x11c   : > { %v3017_v41 = vshll.u32 %v878_v5, 8  ;;  %v3467_v16 = vand.u32 2147483647, %v2747_v43  ;;  %v755_v19 = vadd.s32 3, %v3006_v6  ;;  %v3021_v51 = vshrl.u32 %v882_v2, 5 }
 0x11d   : > { %v745_v59 = vmul.f32 %v744_v4, %v742_v61  ;;  %v827_v30 = vadd.s32 536870912, %v826_v15  ;;  %vm768_vm4 = vcmp.lt.s32.totalorder %v2662_v20, 0  ;;  %v887_v60 = vshll.u32 %v2393_v40, %v884_v13 }
 0x11e   : > { %v890_v35 = vshll.u32 %v2394_v44, %v884_v13  ;;  %v894_v42 = vshrl.u32 %v2396_v48, %v885_v7  ;;  %v897_v23 = vshrl.u32 %v2397_v50, %v885_v7  ;;  %v893_v55 = vshll.u32 %v2395_v46, %v884_v13 }
 0x11f   : > { %v746_v47 = vxor.u32 2147483648, %v745_v59  ;;  %v828_v25 = vshrl.u32 %v827_v30, 30  ;;  %v896_v17 = vshll.u32 %v2396_v48, %v884_v13  ;;  %v3030_v32 = vpop.eup %2294  ;;  %v889_v2 = vor.u32 %v888_v45, %v887_v60 }
 0x120   : > { %v892_v38 = vor.u32 %v891_v63, %v890_v35  ;;  %v899_v33 = vshll.u32 %v2397_v50, %v884_v13  ;;  %v900_v5 = vshrl.u32 %v2398_v57, %v885_v7  ;;  %v977_v61 = vand.u32 2139095040, %v2747_v43 }
 0x121   : > { %v747_v34 = vsel %vm664_vm6, %v746_v47, %v745_v59  ;;  %v829_v36 = vshll.u32 %v828_v25, 30  ;;  %v898_v1 = vor.u32 %v897_v23, %v896_v17  ;;  %v3469_v4 = vxor.u32 2147483648, %v3013_v21 }
 0x122   : > { %v750_v30 = vsel %vm2951_vm13, %v2656_v3, %v747_v34  ;;  %v3483_v45 = vand.u32 2147483647, %v2662_v20  ;;  %v895_v13 = vor.u32 %v894_v42, %v893_v55  ;;  %v901_v60 = vor.u32 %v900_v5, %v899_v33 }
 0x123   : > { %v3470_v59 = vxor.u32 2147483648, %v3030_v32  ;;  %v3048_v35 = vsub.s32 %v826_v15, %v829_v36  ;;  %v852_v23 = vsub.s32 4, %v828_v25  ;;  %vm902_vm6 = vcmp.lt.s32.totalorder %v3021_v51, 1 }
 0x124   : > { %vm3043_vm5 = vcmp.le.f32.partialorder %v3483_v45, 0.7853982  ;;  %vm546_vm7 = vweird.f32 %v2509_v18  ;;  %v886_v27 = vshrl.u32 %v2393_v40, %v885_v7  ;;  %vm903_vm8 = vcmp.lt.s32.totalorder %v3021_v51, 2 }
 0x125   : > { %vm905_vm9 = vcmp.lt.s32.totalorder %v3021_v51, 4  ;;  %v910_v47 = vsel %vm902_vm6, %v889_v2, %v892_v38  ;;  %2296 = vcosq.f32 %v750_v30  ;;  %v832_v42 = vsub.s32 0, %v3048_v35 }
 0x126   : > { %vm904_vm10 = vcmp.lt.s32.totalorder %v3021_v51, 3  ;;  %v911_v15 = vsel %vm905_vm9, %v898_v1, 920167782  ;;  %v907_v55 = vsel %vm905_vm9, %v895_v13, 2102212464  ;;  %v914_v7 = vsel %vm902_vm6, %v892_v38, %v895_v13 }
 0x127   : > { %v912_v17 = vsel %vm904_vm10, %v895_v13, %v911_v15  ;;  %v915_v33 = vsel %vm905_vm9, %v901_v60, 1326507024  ;;  %vm653_vm13 = vcmp.lt.s32.totalorder %v3002_v28, 2  ;;  %v2130_v5 = vmin.u32 %v832_v42, %v3048_v35 }
 0x128   : > { %v853_v34 = vsel %vm768_vm4, %v852_v23, %v828_v25  ;;  %v913_v36 = vsel %vm903_vm8, %v910_v47, %v912_v17  ;;  %v916_v45 = vsel %vm904_vm10, %v898_v1, %v915_v33  ;;  %v978_v60 = vshrl.u32 %v977_v61, 23 }
 0x129   : > { %v917_v15 = vsel %vm903_vm8, %v914_v7, %v916_v45  ;;  %v3074_v26 = vmul.u32.u64.low %v3017_v41, %v913_v36  ;;  %v3075_v13 = vmul.u32.u64.high %v3017_v41, %v913_v36, %v3074_v26  ;;  %2298 = vsinq.f32 %v750_v30 }
 0x12a   : > { %v834_v52 = vclz %v2130_v5  ;;  %v906_v42 = vsel %vm902_vm6, %v886_v27, %v889_v2  ;;  %v908_v25 = vsel %vm904_vm10, %v892_v38, %v907_v55  ;;  %v3081_v23 = vand.u32 3, %v755_v19 }
 0x12b   : > { %v3084_v1 = vmul.u32.u64.low %v3017_v41, %v917_v15  ;;  %v3085_v47 = vmul.u32.u64.high %v3017_v41, %v917_v15, %v3084_v1  ;;  %v2137_v17 = vadd.s32 4294967169, %v978_v60  ;;  %vm654_vm14 = vcmp.eq.s32.totalorder %v3002_v28, 0 }
 0x12c   : > { %vm657_vm15 = vcmp.eq.s32.totalorder %v3002_v28, 2  ;;  %v2131_v61 = vadd.s32 4294967294, %v834_v52  ;;  %v3091_v30 = vsel %vm3043_vm5, 0, %v853_v34  ;;  %v909_v2 = vsel %vm903_vm8, %v906_v42, %v908_v25 }
 0x12d   : > { %v928_v19 = vadd.s32 1, %v3075_v13  ;;  %v981_v38 = vand.u32 8388607, %v3467_v16  ;;  %v984_v27 = vadd.s32 1, %v2137_v17  ;;  %v3101_v55 = vsel %vm546_vm7, nan, %v3011_v24 }
 0x12e   : > { %v656_v52 = vsel %vm654_vm14, %v3013_v21, %v3470_v59  ;;  %v659_v51 = vsel %vm657_vm15, %v3469_v4, %v3030_v32  ;;  %vm2132_vm1 = vcmp.lt.s32.totalorder %v2131_v61, 0  ;;  %vm761_vm2 = vcmp.eq.s32.totalorder %v3081_v23, 2 }
 0x12f   : > { %v837_v7 = vsel %vm2132_vm1, 0, %v2131_v61  ;;  %v859_v33 = vadd.s32 3, %v3091_v30  ;;  %vm927_vm3 = vc.u32 %v3085_v47, %v3074_v26  ;;  %v1171_v5 = vand.u32 3, %v2702_v62  ;;  %v3113_v24 = vpop.eup %2296 }
 0x130   : > { %v822_v34 = vadd.s32 %v2967_v49, %v2964_v9  ;;  %v838_v36 = vsub.s32 32, %v837_v7  ;;  %v842_v45 = vsub.s32 4294967266, %v837_v7  ;;  %v925_v15 = vmul.u32 %v3017_v41, %v909_v2 }
 0x131   : > { %v3120_v60 = vsel %vm653_vm13, %v656_v52, %v659_v51  ;;  %v929_v42 = vsel %vm927_vm3, %v928_v19, %v3075_v13  ;;  %v982_v25 = vor.u32 8388608, %v981_v38  ;;  %vm985_vm6 = vcmp.gt.s32.totalorder %v984_v27, 0 }
 0x132   : > { %v839_v1 = vshll.u32 %v3048_v35, %v837_v7  ;;  %v840_v62 = vshrl.u32 %v822_v34, %v838_v36  ;;  %v843_v17 = vadd.s32 127, %v842_v45  ;;  %v930_v61 = vadd.s32 %v929_v42, %v925_v15 }
 0x133   : > { %v3124_v16 = vand.u32 3, %v859_v33  ;;  %v986_v9 = vsel %vm985_vm6, %v984_v27, 0  ;;  %vm1172_vm8 = vcmp.lt.s32.totalorder %v1171_v5, 2  ;;  %vm1173_vm9 = vcmp.eq.s32.totalorder %v1171_v5, 0  ;;  %v3126_v49 = vpop.eup %2298 }
 0x134   : > { %v3468_v28 = vxor.u32 2147483648, %v3113_v24  ;;  %v841_v41 = vor.u32 %v840_v62, %v839_v1  ;;  %v844_v2 = vshll.u32 %v843_v17, 23  ;;  %v931_v52 = vadd.s32 536870912, %v930_v61 }
 0x135   : > { %vm758_vm10 = vcmp.eq.s32.totalorder %v3081_v23, 0  ;;  %v988_v13 = vand.u32 31, %v986_v9  ;;  %v3130_v19 = vshll.u32 %v982_v25, 8  ;;  %v3486_v35 = vxor.u32 2147483648, %v2797_v10 }
 0x136   : > { %vm1176_vm13 = vcmp.eq.s32.totalorder %v1171_v5, 2  ;;  %v845_v27 = vor.u32 4788187, %v844_v2  ;;  %vm872_vm14 = vcmp.lt.s32.totalorder %v2666_v37, 0  ;;  %v932_v51 = vshrl.u32 %v931_v52, 30 }
 0x137   : > { %v1175_v38 = vsel %vm1173_vm9, %v2780_v58, %v3486_v35  ;;  %v3487_v7 = vxor.u32 2147483648, %v2780_v58  ;;  %v3140_v34 = vand.u32 3, %v2751_v0  ;;  %v759_v36 = vxor.u32 2147483648, %v3126_v49 }
 0x138   : > { %v3144_v45 = vadd.s32 %v3074_v26, %v3085_v47  ;;  %v989_v15 = vsub.s32 32, %v988_v13  ;;  %v3147_v42 = vand.u32 3, %v2830_v39  ;;  %v3154_v25 = vsel %vm761_vm2, %v3468_v28, %v3126_v49 }
 0x139   : > { %v1178_v33 = vsel %vm1176_vm13, %v3487_v7, %v2797_v10  ;;  %v846_v58 = vand.u32 2147483647, %v845_v27  ;;  %v848_v10 = vcvt.s32.f32 %v841_v41  ;;  %v933_v0 = vshll.u32 %v932_v51, 30 }
 0x13a   : > { %v992_v1 = vshrl.u32 %v2394_v44, %v989_v15  ;;  %v995_v62 = vshrl.u32 %v2395_v46, %v989_v15  ;;  %v998_v26 = vshrl.u32 %v2396_v48, %v989_v15  ;;  %v3160_v47 = vsel %vm1172_vm8, %v1175_v38, %v1178_v33 }
 0x13b   : > { %v849_v39 = vmul.f32 %v848_v10, %v846_v58  ;;  %v3162_v17 = vsub.s32 %v930_v61, %v933_v0  ;;  %v991_v2 = vshll.u32 %v2393_v40, %v988_v13  ;;  %v1001_v52 = vshrl.u32 %v2397_v50, %v989_v15 }
 0x13c   : > { %v956_v35 = vsub.s32 4, %v932_v51  ;;  %v987_v27 = vshrl.u32 %v986_v9, 5  ;;  %v994_v41 = vshll.u32 %v2394_v44, %v988_v13  ;;  %v997_v7 = vshll.u32 %v2395_v46, %v988_v13 }
 0x13d   : > { %v850_v28 = vxor.u32 2147483648, %v849_v39  ;;  %v936_v4 = vsub.s32 0, %v3162_v17  ;;  %v993_v59 = vor.u32 %v992_v1, %v991_v2  ;;  %v1000_v5 = vshll.u32 %v2396_v48, %v988_v13 }
 0x13e   : > { %v3488_v38 = vand.u32 2147483647, %v2666_v37  ;;  %v996_v33 = vor.u32 %v995_v62, %v994_v41  ;;  %v999_v58 = vor.u32 %v998_v26, %v997_v7  ;;  %v1003_v9 = vshll.u32 %v2397_v50, %v988_v13 }
 0x13f   : > { %v1004_v44 = vshrl.u32 %v2398_v57, %v989_v15  ;;  %v3183_v46 = vsel %vm758_vm10, %v3113_v24, %v759_v36  ;;  %v851_v48 = vsel %vm768_vm4, %v850_v28, %v849_v39  ;;  %v2134_v10 = vmin.u32 %v936_v4, %v3162_v17 }
 0x140   : > { %vm3172_vm15 = vcmp.le.f32.partialorder %v3488_v38, 0.7853982  ;;  %v1002_v0 = vor.u32 %v1001_v52, %v1000_v5  ;;  %v854_v1 = vsel %vm3043_vm5, %v2662_v20, %v851_v48  ;;  %v957_v50 = vsel %vm872_vm14, %v956_v35, %v932_v51 }
 0x141   : > { %v990_v57 = vshrl.u32 %v2393_v40, %v989_v15  ;;  %v1005_v13 = vor.u32 %v1004_v44, %v1003_v9  ;;  %2300 = vcosq.f32 %v854_v1  ;;  %v938_v62 = vclz %v2134_v10 }
 0x142   : > { %vm1006_vm1 = vcmp.lt.s32.totalorder %v987_v27, 1  ;;  %vm1009_vm2 = vcmp.lt.s32.totalorder %v987_v27, 4  ;;  %2302 = vsinq.f32 %v854_v1  ;;  %vm1007_vm3 = vcmp.lt.s32.totalorder %v987_v27, 2 }
 0x143   : > { %v1011_v28 = vsel %vm1009_vm2, %v999_v58, 2102212464  ;;  %v1014_v26 = vsel %vm1006_vm1, %v993_v59, %v996_v33  ;;  %v2135_v4 = vadd.s32 4294967294, %v938_v62  ;;  %vm1008_vm4 = vcmp.lt.s32.totalorder %v987_v27, 3 }
 0x144   : > { %v1015_v39 = vsel %vm1009_vm2, %v1002_v0, 920167782  ;;  %v1018_v2 = vsel %vm1006_vm1, %v996_v33, %v999_v58  ;;  %v1010_v63 = vsel %vm1006_vm1, %v990_v57, %v993_v59  ;;  %v1012_v52 = vsel %vm1008_vm4, %v996_v33, %v1011_v28 }
 0x145   : > { %v1016_v41 = vsel %vm1008_vm4, %v999_v58, %v1015_v39  ;;  %v1019_v7 = vsel %vm1009_vm2, %v1005_v13, 1326507024  ;;  %vm757_vm5 = vcmp.lt.s32.totalorder %v3081_v23, 2  ;;  %vm2136_vm6 = vcmp.lt.s32.totalorder %v2135_v4, 0 }
 0x146   : > { %v1017_v40 = vsel %vm1007_vm3, %v1014_v26, %v1016_v41  ;;  %v1020_v51 = vsel %vm1008_vm4, %v1002_v0, %v1019_v7  ;;  %vm1276_vm8 = vcmp.eq.s32.totalorder %v3140_v34, 0  ;;  %v941_v15 = vsel %vm2136_vm6, 0, %v2135_v4 }
 0x147   : > { %v1021_v35 = vsel %vm1007_vm3, %v1018_v2, %v1020_v51  ;;  %v3199_v5 = vmul.u32.u64.low %v3130_v19, %v1017_v40  ;;  %v3200_v38 = vmul.u32.u64.high %v3130_v19, %v1017_v40, %v3199_v5  ;;  %v942_v59 = vsub.s32 32, %v941_v15 }
 0x148   : > { %v946_v33 = vsub.s32 4294967266, %v941_v15  ;;  %v3205_v58 = vsel %vm3172_vm15, 0, %v957_v50  ;;  %v1013_v9 = vsel %vm1007_vm3, %v1010_v63, %v1012_v52  ;;  %vm865_vm9 = vcmp.eq.s32.totalorder %v3124_v16, 2 }
 0x149   : > { %v3210_v44 = vmul.u32.u64.low %v3130_v19, %v1021_v35  ;;  %v3211_v48 = vmul.u32.u64.high %v3130_v19, %v1021_v35, %v3210_v44  ;;  %v3491_v10 = vxor.u32 2147483648, %v2836_v53  ;;  %vm1279_vm10 = vcmp.eq.s32.totalorder %v3140_v34, 2 }
 0x14a   : > { %vm862_vm13 = vcmp.eq.s32.totalorder %v3124_v16, 0  ;;  %v943_v1 = vshll.u32 %v3162_v17, %v941_v15  ;;  %v944_v50 = vshrl.u32 %v3144_v45, %v942_v59  ;;  %v947_v27 = vadd.s32 127, %v946_v33 }
 0x14b   : > { %v1278_v0 = vsel %vm1276_vm8, %v2805_v14, %v3491_v10  ;;  %v3492_v57 = vxor.u32 2147483648, %v2805_v14  ;;  %v963_v62 = vadd.s32 3, %v3205_v58  ;;  %v1029_v28 = vmul.u32 %v3130_v19, %v1013_v9  ;;  %v3227_v4 = vpop.eup %2300 }
 0x14c   : > { %v1032_v26 = vadd.s32 1, %v3200_v38  ;;  %vm1275_vm1 = vcmp.lt.s32.totalorder %v3140_v34, 2  ;;  %v945_v39 = vor.u32 %v944_v50, %v943_v1  ;;  %v948_v2 = vshll.u32 %v947_v27, 23  ;;  %v2303_v45 = vpop.eup %2302 }
 0x14d   : > { %v1281_v13 = vsel %vm1279_vm10, %v3492_v57, %v2836_v53  ;;  %vm1379_vm2 = vcmp.eq.s32.totalorder %v3147_v42, 0  ;;  %vm1382_vm3 = vcmp.eq.s32.totalorder %v3147_v42, 2  ;;  %vm861_vm4 = vcmp.lt.s32.totalorder %v3124_v16, 2 }
 0x14e   : > { %vm1031_vm6 = vc.u32 %v3211_v48, %v3199_v5  ;;  %v1282_v14 = vsel %vm1275_vm1, %v1278_v0, %v1281_v13  ;;  %v3493_v53 = vxor.u32 2147483648, %v2899_v54  ;;  %v3494_v34 = vxor.u32 2147483648, %v2892_v29 }
 0x14f   : > { %v866_v63 = vxor.u32 2147483648, %v3227_v4  ;;  %v949_v52 = vor.u32 4788187, %v948_v2  ;;  %v1033_v41 = vsel %vm1031_vm6, %v1032_v26, %v3200_v38  ;;  %v1480_v7 = vand.u32 3, %v2887_v31 }
 0x150   : > { %v1381_v19 = vsel %vm1379_vm2, %v2892_v29, %v3493_v53  ;;  %v1384_v17 = vsel %vm1382_vm3, %v3494_v34, %v2899_v54  ;;  %v764_v40 = vsel %vm757_vm5, %v3183_v46, %v3154_v25  ;;  %v863_v51 = vxor.u32 2147483648, %v2303_v45 }
 0x151   : > { %v1034_v15 = vadd.s32 %v1033_v41, %v1029_v28  ;;  %v3250_v35 = vsel %vm338_vm11, nan, %v3160_v47  ;;  %v950_v29 = vand.u32 2147483647, %v949_v52  ;;  %v952_v54 = vcvt.s32.f32 %v945_v39 }
 0x152   : > { %vm1378_vm8 = vcmp.lt.s32.totalorder %v3147_v42, 2  ;;  %v1583_v38 = vand.u32 3, %v3006_v6  ;;  %vm650_vm10 = vweird.f32 %v2596_v22  ;;  %vm754_vm1 = vweird.f32 %v2656_v3 }
 0x153   : > { %v3256_v31 = vand.u32 3, %v963_v62  ;;  %v1035_v23 = vadd.s32 536870912, %v1034_v15  ;;  %v3260_v25 = vsel %vm442_vm12, nan, %v1282_v14  ;;  %v1385_v11 = vsel %vm1378_vm8, %v1381_v19, %v1384_v17 }
 0x154   : > { %vm858_vm11 = vweird.f32 %v2662_v20  ;;  %v867_v47 = vsel %vm865_vm9, %v866_v63, %v2303_v45  ;;  %v953_v42 = vmul.f32 %v952_v54, %v950_v29  ;;  %vm1482_vm5 = vcmp.eq.s32.totalorder %v1480_v7, 0 }
 0x155   : > { %vm1485_vm2 = vcmp.eq.s32.totalorder %v1480_v7, 2  ;;  %v864_v6 = vsel %vm862_vm13, %v3227_v4, %v863_v51  ;;  %v3268_v46 = vshrl.u32 %v1035_v23, 30  ;;  %v3495_v59 = vxor.u32 2147483648, %v3030_v32 }
 0x156   : > { %v3496_v33 = vxor.u32 2147483648, %v3013_v21  ;;  %v954_v44 = vxor.u32 2147483648, %v953_v42  ;;  %vm1585_vm12 = vcmp.eq.s32.totalorder %v1583_v38, 0  ;;  %vm1588_vm9 = vcmp.eq.s32.totalorder %v1583_v38, 2 }
 0x157   : > { %v1484_v12 = vsel %vm1482_vm5, %v3013_v21, %v3495_v59  ;;  %v1686_v10 = vand.u32 3, %v3091_v30  ;;  %v1037_v0 = vshll.u32 %v3268_v46, 30  ;;  %vm1481_vm3 = vcmp.lt.s32.totalorder %v1480_v7, 2 }
 0x158   : > { %v1487_v9 = vsel %vm1485_vm2, %v3496_v33, %v3030_v32  ;;  %v1587_v1 = vsel %vm1585_vm12, %v3113_v24, %v759_v36  ;;  %v3497_v50 = vxor.u32 2147483648, %v3113_v24  ;;  %v868_v21 = vsel %vm861_vm4, %v864_v6, %v867_v47 }
 0x159   : > { %v955_v32 = vsel %vm872_vm14, %v954_v44, %v953_v42  ;;  %vm1584_vm13 = vcmp.lt.s32.totalorder %v1583_v38, 2  ;;  %vm1688_vm6 = vcmp.eq.s32.totalorder %v1686_v10, 0  ;;  %v3291_v57 = vsub.s32 %v1034_v15, %v1037_v0 }
 0x15a   : > { %v1590_v27 = vsel %vm1588_vm9, %v3497_v50, %v3126_v49  ;;  %v958_v30 = vsel %vm3172_vm15, %v2666_v37, %v955_v32  ;;  %v1488_v36 = vsel %vm1481_vm3, %v1484_v12, %v1487_v9  ;;  %v1690_v13 = vsel %vm1688_vm6, %v3227_v4, %v863_v51 }
 0x15b   : > { %2304 = vcosq.f32 %v958_v30  ;;  %v1591_v24 = vsel %vm1584_vm13, %v1587_v1, %v1590_v27  ;;  %vm1691_vm8 = vcmp.eq.s32.totalorder %v1686_v10, 2  ;;  %v3296_v16 = vand.u32 3, %v3205_v58 }
 0x15c   : > { %2306 = vsinq.f32 %v958_v30  ;;  %v1040_v49 = vsub.s32 0, %v3291_v57  ;;  %vm1687_vm14 = vcmp.lt.s32.totalorder %v1686_v10, 2  ;;  %v1693_v62 = vsel %vm1691_vm8, %v866_v63, %v2303_v45 }
 0x15d   : > { %v661_v61 = vsel %vm650_vm10, nan, %v3120_v60  ;;  %v765_v28 = vsel %vm754_vm1, nan, %v764_v40  ;;  %v1030_v26 = vadd.s32 %v3199_v5, %v3211_v48  ;;  %v1694_v4 = vsel %vm1687_vm14, %v1690_v13, %v1693_v62 }
 0x15e   : > { %v3312_v58 = vsel %vm858_vm11, nan, %v868_v21  ;;  %v2138_v39 = vmin.u32 %v1040_v49, %v3291_v57  ;;  %v1386_v2 = vsel %vm546_vm7, nan, %v1385_v11  ;;  %v1489_v60 = vsel %vm650_vm10, nan, %v1488_v36 }
 0x15f   : > { %vm969_vm15 = vcmp.eq.s32.totalorder %v3256_v31, 2  ;;  %v1592_v5 = vsel %vm754_vm1, nan, %v1591_v24  ;;  %v1695_v48 = vsel %vm858_vm11, nan, %v1694_v4  ;;  %v1904_v45 = vrot.slane %v3250_v35, 4 }
 0x160   : > { %v1905_v14 = vrot.slane %v3260_v25, 4  ;;  %vm966_vm4 = vcmp.eq.s32.totalorder %v3256_v31, 0  ;;  %v1042_v53 = vclz %v2138_v39  ;;  %vm1791_vm7 = vcmp.eq.s32.totalorder %v3296_v16, 0 }
 0x161   : > { %vm1794_vm5 = vcmp.eq.s32.totalorder %v3296_v16, 2  ;;  %v1910_v18 = vrot.slane %v2993_v8, 4  ;;  %vm965_vm10 = vcmp.lt.s32.totalorder %v3256_v31, 2  ;;  %v1911_v22 = vrot.slane %v2999_v56, 4 }
 0x162   : > { %v1916_v3 = vrot.slane %v1386_v2, 4  ;;  %v1917_v20 = vrot.slane %v1489_v60, 4  ;;  %v1922_v19 = vrot.slane %v3101_v55, 4  ;;  %vm962_vm1 = vweird.f32 %v2666_v37 }
 0x163   : > { %v2139_v34 = vadd.s32 4294967294, %v1042_v53  ;;  %v1923_v17 = vrot.slane %v661_v61, 4  ;;  %v1928_v63 = vrot.slane %v1592_v5, 4  ;;  %v1929_v52 = vrot.slane %v1695_v48, 4 }
 0x164   : > { %v1934_v41 = vrot.slane %v765_v28, 4  ;;  %v1935_v7 = vrot.slane %v3312_v58, 4  ;;  %v1950_v40 = vsel %vm215_vm0, %v2993_v8, %v1904_v45  ;;  %v1951_v51 = vsel %vm215_vm0, %v2999_v56, %v1905_v14 }
 0x165   : > { %vm2140_vm11 = vcmp.lt.s32.totalorder %v2139_v34, 0  ;;  %v1952_v15 = vsel %vm215_vm0, %v1910_v18, %v3250_v35  ;;  %v1953_v29 = vsel %vm215_vm0, %v1911_v22, %v3260_v25  ;;  %v1954_v54 = vsel %vm215_vm0, %v3101_v55, %v1916_v3  ;;  %1966 = vst [vmem:[%s3346_s16] sm:$0xff] %v1950_v40  ;;  %1967 = vst [vmem:[%s3346_s16 + $0x8] sm:$0xff] %v1951_v51  ;;  %v2305_v8 = vpop.eup %2304 }
 0x166   : > { %v1045_v56 = vsel %vm2140_vm11, 0, %v2139_v34  ;;  %v1955_v35 = vsel %vm215_vm0, %v661_v61, %v1917_v20  ;;  %v1956_v38 = vsel %vm215_vm0, %v1922_v19, %v1386_v2  ;;  %v1957_v55 = vsel %vm215_vm0, %v1923_v17, %v1489_v60  ;;  %1968 = vst [vmem:[%s3346_s16 + $0x10] sm:$0xff] %v1952_v15  ;;  %1969 = vst [vmem:[%s3346_s16 + $0x18] sm:$0xff] %v1953_v29  ;;  %v2307_v23 = vpop.eup %2306 }
 0x167   : > { %1970 = vst [vmem:[%s3346_s16 + $0x20] sm:$0xff] %v1954_v54  ;;  %v970_v25 = vxor.u32 2147483648, %v2305_v8  ;;  %v1046_v11 = vsub.s32 32, %v1045_v56  ;;  %v1047_v47 = vshll.u32 %v3291_v57, %v1045_v56  ;;  %v1050_v42 = vsub.s32 4294967266, %v1045_v56  ;;  %1971 = vst [vmem:[%s3346_s16 + $0x28] sm:$0xff] %v1955_v35 }
 0x168   : > { %1972 = vst [vmem:[%s3346_s16 + $0x30] sm:$0xff] %v1956_v38  ;;  %1973 = vst [vmem:[%s3346_s16 + $0x38] sm:$0xff] %v1957_v55  ;;  %v967_v6 = vxor.u32 2147483648, %v2307_v23  ;;  %v1958_v59 = vsel %vm215_vm0, %v765_v28, %v1928_v63  ;;  %v1959_v12 = vsel %vm215_vm0, %v3312_v58, %v1929_v52  ;;  %v1960_v33 = vsel %vm215_vm0, %v1934_v41, %v1592_v5 }
 0x169   : > { %v971_v9 = vsel %vm969_vm15, %v970_v25, %v2307_v23  ;;  %v1048_v44 = vshrl.u32 %v1030_v26, %v1046_v11  ;;  %v1051_v10 = vadd.s32 127, %v1050_v42  ;;  %v1796_v0 = vsel %vm1794_vm5, %v970_v25, %v2307_v23  ;;  %1974 = vst [vmem:[%s3346_s16 + $0x40] sm:$0xff] %v1958_v59  ;;  %1975 = vst [vmem:[%s3346_s16 + $0x48] sm:$0xff] %v1959_v12 }
 0x16a   : > { %1976 = vst [vmem:[%s3346_s16 + $0x50] sm:$0xff] %v1960_v33  ;;  %v968_v1 = vsel %vm966_vm4, %v2305_v8, %v967_v6  ;;  %vm1790_vm2 = vcmp.lt.s32.totalorder %v3296_v16, 2  ;;  %v1793_v50 = vsel %vm1791_vm7, %v2305_v8, %v967_v6  ;;  %v1961_v27 = vsel %vm215_vm0, %v1935_v7, %v1695_v48 }
 0x16b   : > { %v972_v21 = vsel %vm965_vm10, %v968_v1, %v971_v9  ;;  %v1049_v32 = vor.u32 %v1048_v44, %v1047_v47  ;;  %v1052_v30 = vshll.u32 %v1051_v10, 23  ;;  %v1797_v57 = vsel %vm1790_vm2, %v1793_v50, %v1796_v0  ;;  %1977 = vst [vmem:[%s3346_s16 + $0x58] sm:$0xff] %v1961_v27 }
 0x16c   : > { %v973_v36 = vsel %vm962_vm1, nan, %v972_v21  ;;  %v1798_v13 = vsel %vm962_vm1, nan, %v1797_v57  ;;  %v1060_v4 = vsub.s32 4, %v3268_v46  ;;  %vm976_vm12 = vcmp.lt.s32.totalorder %v2747_v43, 0 }
 0x16d   : > { %v1053_v24 = vor.u32 4788187, %v1052_v30  ;;  %v1940_v16 = vrot.slane %v1798_v13, 4  ;;  %v1946_v49 = vrot.slane %v973_v36, 4  ;;  %v1056_v61 = vcvt.s32.f32 %v1049_v32 }
 0x16e   : > { %v3498_v37 = vand.u32 2147483647, %v2747_v43  ;;  %v1061_v2 = vsel %vm976_vm12, %v1060_v4, %v3268_v46  ;;  %vm1066_vm4 = vweird.f32 %v2747_v43 }
 0x16f   : > { %v1054_v62 = vand.u32 2147483647, %v1053_v24  ;;  %v1962_v28 = vsel %vm215_vm0, %v973_v36, %v1940_v16  ;;  %v1964_v31 = vsel %vm215_vm0, %v1946_v49, %v1798_v13 }
 0x170   : > { %1978 = vst [vmem:[%s3346_s16 + $0x60] sm:$0xff] %v1962_v28  ;;  %1980 = vst [vmem:[%s3346_s16 + $0x70] sm:$0xff] %v1964_v31  ;;  %vm975_vm9 = vcmp.le.f32.partialorder %v3498_v37, 0.7853982 }
 0x171   : > { %v1057_v26 = vmul.f32 %v1056_v61, %v1054_v62  ;;  %v1063_v5 = vsel %vm975_vm9, 0, %v1061_v2 }
 0x172   : > { %v1067_v48 = vadd.s32 3, %v1063_v5  ;;  %v1892_v14 = vand.u32 3, %v1063_v5 }
 0x173   : > { %v1058_v58 = vxor.u32 2147483648, %v1057_v26 }
 0x174   : > { %v1068_v45 = vand.u32 3, %v1067_v48  ;;  %vm1897_vm13 = vcmp.eq.s32.totalorder %v1892_v14, 2  ;;  %vm1894_vm8 = vcmp.eq.s32.totalorder %v1892_v14, 0  ;;  %vm1893_vm15 = vcmp.lt.s32.totalorder %v1892_v14, 2 }
 0x175   : > { %v1059_v39 = vsel %vm976_vm12, %v1058_v58, %v1057_v26 }
 0x176   : > { %v1062_v60 = vsel %vm975_vm9, %v2747_v43, %v1059_v39  ;;  %vm1073_vm3 = vcmp.eq.s32.totalorder %v1068_v45, 2  ;;  %vm1070_vm6 = vcmp.eq.s32.totalorder %v1068_v45, 0  ;;  %vm1069_vm14 = vcmp.lt.s32.totalorder %v1068_v45, 2 }
 0x177   : > { %2308 = vcosq.f32 %v1062_v60 }
 0x178   : > { %2310 = vsinq.f32 %v1062_v60 }
 0x181   : > { %v2309_v53 = vpop.eup %2308 }
 0x182   : > { %v2311_v18 = vpop.eup %2310  ;;  %v1074_v22 = vxor.u32 2147483648, %v2309_v53 }
 0x183   : > { %v1071_v3 = vxor.u32 2147483648, %v2311_v18 }
 0x184   : > { %v1075_v20 = vsel %vm1073_vm3, %v1074_v22, %v2311_v18  ;;  %v1899_v46 = vsel %vm1897_vm13, %v1074_v22, %v2311_v18 }
 0x185   : > { %v1072_v19 = vsel %vm1070_vm6, %v2309_v53, %v1071_v3  ;;  %v1896_v34 = vsel %vm1894_vm8, %v2309_v53, %v1071_v3 }
 0x186   : > { %v1076_v17 = vsel %vm1069_vm14, %v1072_v19, %v1075_v20  ;;  %v1900_v63 = vsel %vm1893_vm15, %v1896_v34, %v1899_v46 }
 0x187   : > { %v1077_v52 = vsel %vm1066_vm4, nan, %v1076_v17  ;;  %v1901_v41 = vsel %vm1066_vm4, nan, %v1900_v63 }
 0x188   : > { %v1941_v7 = vrot.slane %v1901_v41, 4  ;;  %v1947_v40 = vrot.slane %v1077_v52, 4 }
 0x18a   : > { %v1963_v51 = vsel %vm215_vm0, %v1077_v52, %v1941_v7  ;;  %v1965_v43 = vsel %vm215_vm0, %v1947_v40, %v1901_v41 }
 0x18b   : > { %1979 = vst [vmem:[%s3346_s16 + $0x68] sm:$0xff] %v1963_v51  ;;  %1981 = vst [vmem:[%s3346_s16 + $0x78] sm:$0xff] %v1965_v43 }
 0x18c   : > { %2325 = shalt.err (!%p2322_p5)
}
 0x18d   : > { %s2326_s30 = scalar_lea.hbm %s3400_s25, 2048  ;;  %s2330_s5 = scalar_lea.hbm %s3458_s2, 4096 }
 0x18e   : > { %p2327_p6 = scmp.ne.s32.totalorder %s3400_s25, %s2326_s30  ;;  %p2331_p10 = scmp.lt.u32.totalorder %s3400_s25, %s3458_s2 }
 0x18f   : > { %p2332_p11 = scmp.lt.u32.totalorder %s2330_s5, %s2326_s30  ;;  %p2334_p13 = scmp.lt.u32.totalorder %s2326_s30, %s3400_s25 }
 0x190   : > { %p2328_p7 = pnand %p2327_p6, %p2457_p4 }
 0x191   : > { %p2333_p12 = por %p2332_p11, %p2331_p10 }
 0x192   : > { %p2329_p9 = pneg %p2328_p7 }
 0x193   : > { %p2335_p0 = por %p2334_p13, %p2333_p12 }
 0x195   : > { %p2336_p1 = pnand %p2335_p0, %p2329_p9 }
 0x197   : > { %2339 = shalt.err (!%p2336_p1)
}
 0x198   : > { %s2400_s8 = smov 256   ;;  %s2401_s15 = smov 16  }
 0x199   : > { %2212 = dma.vmem_to_hbm [thread:$0]  (%p2457_p4), %s3402_s20, 2048, %s3400_s25, %s3410_s12, %s2400_s8, %s2400_s8, %s2401_s15  }
 0x19a PF: > { %p2218_p2 = scmp.ge.s32.totalorder %s2390_s14, 2  ;;  %s2016_s16 = sand.u32 1, %s2370_s9  }
 0x19b   : > { %s2017_s18 = scalar_lea.sflag [#allocation3], %s2016_s16 }
 0x19c   : > { %p2215_p3 = pnand %p2218_p2, %p2464_p8 }
 0x19e   : > { %2365 = dma.done.wait (!%p2215_p3), %s2017_s18, 2048  }
 0x19f   : > { %2367 = vsyncadd (!%p2215_p3), %s2017_s18, 4294965248  ;;  %s15_s14 = sadd.s32 1, %s2390_s14   ;;  %s3499_s9 = smov %s2374_s10 }
 0x1a0   : > { %p12_p5 = scmp.ge.s32.totalorder %s15_s14, 4   ;;  %s3500_s10 = smov %s2378_s11 }
 0x1a1   : > { %s3501_s11 = smov %s2470_s22  ;;  %s3502_s12 = smov %s2386_s13 }
 0x1a2   : > { %s3503_s13 = smov %s3505_s17  ;;  %14 = sbr.rel (!%p12_p5) target bundleno = 4 (0x4), region = 66 }
 0x1a9   :  { %2022 = vsyncpa [#allocation3], 1 }
 0x1aa   :  { %2024 = vsyncpa [#allocation3 + $0x1], 1 }

</bundles_post_ra>
